<compile_context>
chip_gen: v7x
topology: tpu7x:2x2x1
jax: 0.10.0
libtpu: 0.0.40
codegen_flags: <defaults>
</compile_context>

<pallas_src>
import functools

import jax
import jax.numpy as jnp
from jax.experimental import pallas as pl
from jax.experimental.pallas import tpu as pltpu


def _round_up(x, m):
    return ((x + m - 1) // m) * m


def downsample_kernel(x0_ref, x1_ref, x2_ref, wa_ref, wb0_ref, wb1_ref,
                      wc_ref, wd_ref, g_ref, b_ref, o_ref,
                      *, Ho, W8, C, Cout, eps, th):
    """One grid step = full (Ho*W8, Coutp) conv+LN slab for one (batch, out-depth).

    x{kd}_ref : (Ho+1, W8+1, 4C)  parity-folded padded input plane for depth tap kd
                (minor dim = h_parity*2C + w_parity*C + c)
    wa_ref    : (3, 4C, Coutp)    taps (kh,kw) in {0,1}^2, fused K=4C
    wb0_ref   : (3,  C, Coutp)    tap (kh=0, kw=2)
    wb1_ref   : (3,  C, Coutp)    tap (kh=1, kw=2)
    wc_ref    : (3, 2C, Coutp)    taps (kh=2, kw in {0,1}), fused K=2C
    wd_ref    : (3,  C, Coutp)    tap (kh=2, kw=2)
    g_ref/b_ref: (1, Coutp)       LayerNorm affine params (zero padded)
    o_ref     : (Ho*W8, Coutp)    conv + LayerNorm output (f32)
    """
    Coutp = o_ref.shape[-1]
    x_refs = (x0_ref, x1_ref, x2_ref)
    inv_n = jnp.float32(1.0 / Cout)

    # Static chunking over output rows so the f32 accumulator stays in registers
    # and each chunk is stored exactly once (no scratch, no RMW through VMEM).
    for h0 in range(0, Ho, th):
        hsz = min(th, Ho - h0)
        m = hsz * W8                      # W8 % 8 == 0  ->  reshapes below are free
        acc = jnp.zeros((m, Coutp), jnp.float32)

        for kd in range(3):
            xr = x_refs[kd]
            # (kh, kw) in {0,1}^2 : one fused K=4C matmul at folded offset (0, 0).
            a = xr[h0:h0 + hsz, 0:W8, :].reshape(m, 4 * C)
            acc = acc + jnp.dot(a, wa_ref[kd], preferred_element_type=jnp.float32)
            # kh=0, kw=2 : folded offset (0, +1), channels hp=0,wp=0 -> [0:C].
            a = xr[h0:h0 + hsz, 1:W8 + 1, 0:C].reshape(m, C)
            acc = acc + jnp.dot(a, wb0_ref[kd], preferred_element_type=jnp.float32)
            # kh=1, kw=2 : folded offset (0, +1), channels hp=1,wp=0 -> [2C:3C].
            a = xr[h0:h0 + hsz, 1:W8 + 1, 2 * C:3 * C].reshape(m, C)
            acc = acc + jnp.dot(a, wb1_ref[kd], preferred_element_type=jnp.float32)
            # kh=2, kw in {0,1} : folded offset (+1, 0), channels hp=0 -> [0:2C].
            a = xr[h0 + 1:h0 + hsz + 1, 0:W8, 0:2 * C].reshape(m, 2 * C)
            acc = acc + jnp.dot(a, wc_ref[kd], preferred_element_type=jnp.float32)
            # kh=2, kw=2 : folded offset (+1, +1), channels [0:C].
            a = xr[h0 + 1:h0 + hsz + 1, 1:W8 + 1, 0:C].reshape(m, C)
            acc = acc + jnp.dot(a, wd_ref[kd], preferred_element_type=jnp.float32)

        # ---- fused LayerNorm over the real Cout channels (f32) ---------------
        # Padded weight columns are exact zeros, so full-row sums equal sums over
        # the Cout real channels.
        mean = jnp.sum(acc, axis=1, keepdims=True) * inv_n
        diff = acc - mean
        if Coutp != Cout:
            col = jax.lax.broadcasted_iota(jnp.int32, (1, Coutp), 1)
            diff = jnp.where(col < Cout, diff, 0.0)   # masked, centered values
        var = jnp.sum(diff * diff, axis=1, keepdims=True) * inv_n
        inv_std = jax.lax.rsqrt(var + jnp.float32(eps))
        o_ref[h0 * W8:(h0 + hsz) * W8, :] = (
            diff * inv_std * g_ref[...] + b_ref[...]).astype(o_ref.dtype)


@functools.partial(jax.jit, static_argnames=("eps", "mxu_dtype"))
def downsample_forward(x, weight, gamma, beta, *, eps=1e-5,
                       mxu_dtype=jnp.bfloat16):
    """InternImage DownsampleLayer forward.

    x      : (N, D, H, W, C) channels-last input
    weight : (2C, C, 3, 3, 3) torch-layout Conv3d weight (no bias)
    gamma, beta : (2C,) LayerNorm affine params
    returns: (N, Do, Ho, Wo, 2C) channels-last, float32
    """
    N, D, H, W, C = x.shape
    Cout = weight.shape[0]
    assert weight.shape == (Cout, C, 3, 3, 3)

    Do = (D - 1) // 2 + 1
    Ho = (H - 1) // 2 + 1
    Wo = (W - 1) // 2 + 1
    W8 = _round_up(Wo, 8)            # pad W tile so in-kernel reshapes are free
    M8 = Ho * W8
    Coutp = _round_up(Cout, 128)     # lane-dense output stores
    pad_c = Coutp - Cout

    # ---- input parity fold: (N,D,H,W,C) -> (N, Do+1, 2, Ho+1, W8+1, 4C) --------
    xp = jnp.pad(x, ((0, 0), (1, 2 * Do + 1 - D), (1, 2 * Ho + 1 - H),
                     (1, 2 * W8 + 1 - W), (0, 0)))
    xr = xp.reshape(N, Do + 1, 2, Ho + 1, 2, W8 + 1, 2, C)
    xr = xr.transpose(0, 1, 2, 3, 5, 4, 6, 7)          # H-parity next to W-parity
    xr = xr.reshape(N, Do + 1, 2, Ho + 1, W8 + 1, 4 * C).astype(mxu_dtype)

    # ---- weights: torch (Cout, C, kd, kh, kw) -> fused per-tap-group matrices --
    wt = jnp.transpose(weight, (2, 3, 4, 1, 0))        # (kd, kh, kw, C, Cout)

    def prep(w):                                       # pad Cout + cast for MXU
        return jnp.pad(w, [(0, 0)] * (w.ndim - 1) + [(0, pad_c)]).astype(mxu_dtype)

    wa = prep(wt[:, 0:2, 0:2].reshape(3, 4 * C, Cout))  # rows ordered (kh, kw, c)
    wb0 = prep(wt[:, 0, 2])                             # (3, C, Cout)
    wb1 = prep(wt[:, 1, 2])
    wc = prep(wt[:, 2, 0:2].reshape(3, 2 * C, Cout))    # rows ordered (kw, c)
    wd = prep(wt[:, 2, 2])
    g = jnp.pad(gamma.astype(jnp.float32).reshape(1, Cout), ((0, 0), (0, pad_c)))
    b = jnp.pad(beta.astype(jnp.float32).reshape(1, Cout), ((0, 0), (0, pad_c)))

    # Rows per in-kernel accumulation chunk: keep the f32 accumulator ~<=128 KiB.
    rows_target = max(W8, (128 * 1024) // (Coutp * 4))
    th = max(1, min(Ho, rows_target // W8))

    # Explicit VMEM budget derived from the actual per-step block sizes (double
    # buffered) with headroom; capped at 40 MiB so it also fits v7x (64 MiB/TC).
    isz = jnp.dtype(mxu_dtype).itemsize
    need = (2 * 3 * (Ho + 1) * (W8 + 1) * 4 * C * isz   # 3 tap views, 2 buffers
            + 2 * 9 * C * Coutp * isz * 3               # weight matrices
            + 2 * 2 * Coutp * 4                         # gamma / beta
            + 2 * M8 * Coutp * 4                        # output block, 2 buffers
            + 2 * th * W8 * Coutp * 4)                  # accumulator headroom
    vmem_limit = int(min(max(need * 5 // 4 + (2 << 20), 16 << 20), 40 << 20))

    kernel = functools.partial(downsample_kernel, Ho=Ho, W8=W8, C=C,
                               Cout=Cout, eps=eps, th=th)

    # Three views of the same folded array, one per kd tap (D plane + parity).
    x_specs = [
        pl.BlockSpec(
            (None, None, None, Ho + 1, W8 + 1, 4 * C),
            (lambda n, do, kd=kd: (n, do + kd // 2, kd % 2, 0, 0, 0)))
        for kd in range(3)
    ]
    # Grid-invariant operands: constant index_map -> fetched once, never re-DMA'd.
    const2 = lambda n, do: (0, 0)
    const3 = lambda n, do: (0, 0, 0)
    w_specs = [pl.BlockSpec(wa.shape, const3), pl.BlockSpec(wb0.shape, const3),
               pl.BlockSpec(wb1.shape, const3), pl.BlockSpec(wc.shape, const3),
               pl.BlockSpec(wd.shape, const3)]

    out = pl.pallas_call(
        kernel,
        out_shape=jax.ShapeDtypeStruct((N, Do, M8, Coutp), jnp.float32),
        grid=(N, Do),
        in_specs=x_specs + w_specs + [pl.BlockSpec((1, Coutp), const2),
                                      pl.BlockSpec((1, Coutp), const2)],
        out_specs=pl.BlockSpec((None, None, M8, Coutp),
                               lambda n, do: (n, do, 0, 0)),
        compiler_params=pltpu.CompilerParams(
            dimension_semantics=("parallel", "parallel"),
            vmem_limit_bytes=vmem_limit),
    )(xr, xr, xr, wa, wb0, wb1, wc, wd, g, b)

    out = out.reshape(N, Do, Ho, W8, Coutp)
    if W8 != Wo or Coutp != Cout:
        out = out[:, :, :, :Wo, :Cout]    # drop W / channel lane padding
    return out


def reference_downsample(x, weight, gamma, beta, *, eps=1e-5):
    """Plain-JAX reference: conv3d(s=2,k=3,p=1,no bias) + LayerNorm(channels)."""
    w = jnp.transpose(weight, (2, 3, 4, 1, 0))    # DHWIO
    y = jax.lax.conv_general_dilated(
        x, w, window_strides=(2, 2, 2),
        padding=((1, 1), (1, 1), (1, 1)),
        dimension_numbers=("NDHWC", "DHWIO", "NDHWC"),
        precision=jax.lax.Precision.HIGHEST)
    mu = jnp.mean(y, axis=-1, keepdims=True)
    var = jnp.mean(jnp.square(y - mu), axis=-1, keepdims=True)
    return (y - mu) * jax.lax.rsqrt(var + eps) * gamma + beta


if __name__ == "__main__":
    key = jax.random.PRNGKey(0)
    kx, kw, kg, kb = jax.random.split(key, 4)

    N, D, H, W, C = 2, 8, 16, 16, 4        # channels-last input, channels=4
    Cout = 2 * C
    x = jax.random.normal(kx, (N, D, H, W, C), jnp.float32)
    weight = 0.05 * jax.random.normal(kw, (Cout, C, 3, 3, 3), jnp.float32)
    gamma = 1.0 + 0.1 * jax.random.normal(kg, (Cout,), jnp.float32)
    beta = 0.1 * jax.random.normal(kb, (Cout,), jnp.float32)

    out = downsample_forward(x, weight, gamma, beta)   # default bf16 MXU path
    out = jax.block_until_ready(out)

    expected_shape = (N, (D - 1) // 2 + 1, (H - 1) // 2 + 1,
                      (W - 1) // 2 + 1, Cout)
    assert out.shape == expected_shape, (out.shape, expected_shape)
    assert bool(jnp.isfinite(out).all())

    # Tight check: reference on identically bf16-quantized inputs (isolates the
    # kernel's tap/fold algebra from the bf16 cast).
    xq = x.astype(jnp.bfloat16).astype(jnp.float32)
    wq = weight.astype(jnp.bfloat16).astype(jnp.float32)
    ref_q = reference_downsample(xq, wq, gamma, beta)
    err_q = float(jnp.max(jnp.abs(out - ref_q)))
    assert err_q < 5e-3, err_q

    # Loose sanity check against the full-precision reference.
    ref = reference_downsample(x, weight, gamma, beta)
    err = float(jnp.max(jnp.abs(out - ref)))
    assert err < 1e-1, err

    print("KERNEL_OK")
</pallas_src>

<mosaic_0001>
module attributes {stable_mosaic.version = 11 : i64} {
  func.func @downsample_kernel(%arg0: i32, %arg1: i32, %arg2: memref<1x1x1x9x9x16xbf16, #tpu.memory_space<vmem>>, %arg3: memref<1x1x1x9x9x16xbf16, #tpu.memory_space<vmem>>, %arg4: memref<1x1x1x9x9x16xbf16, #tpu.memory_space<vmem>>, %arg5: memref<3x16x128xbf16, #tpu.memory_space<vmem>>, %arg6: memref<3x4x128xbf16, #tpu.memory_space<vmem>>, %arg7: memref<3x4x128xbf16, #tpu.memory_space<vmem>>, %arg8: memref<3x8x128xbf16, #tpu.memory_space<vmem>>, %arg9: memref<3x4x128xbf16, #tpu.memory_space<vmem>>, %arg10: memref<1x128xf32, #tpu.memory_space<vmem>>, %arg11: memref<1x128xf32, #tpu.memory_space<vmem>>, %arg12: memref<1x1x64x128xf32, #tpu.memory_space<vmem>>) attributes {dimension_semantics = [#tpu.dimension_semantics<parallel>, #tpu.dimension_semantics<parallel>], iteration_bounds = array<i64: 2, 4>, scalar_prefetch = 0 : i64, scratch_operands = 0 : i64, tpu.core_type = #tpu.core_type<tc>, window_params = [{transform_indices = @transform_0, window_bounds = array<i64: 1, 1, 1, 9, 9, 16>}, {transform_indices = @transform_1, window_bounds = array<i64: 1, 1, 1, 9, 9, 16>}, {transform_indices = @transform_2, window_bounds = array<i64: 1, 1, 1, 9, 9, 16>}, {pipeline_mode = #tpu.pipeline_mode<synchronous>, transform_indices = @transform_3, window_bounds = array<i64: 3, 16, 128>}, {pipeline_mode = #tpu.pipeline_mode<synchronous>, transform_indices = @transform_4, window_bounds = array<i64: 3, 4, 128>}, {pipeline_mode = #tpu.pipeline_mode<synchronous>, transform_indices = @transform_5, window_bounds = array<i64: 3, 4, 128>}, {pipeline_mode = #tpu.pipeline_mode<synchronous>, transform_indices = @transform_6, window_bounds = array<i64: 3, 8, 128>}, {pipeline_mode = #tpu.pipeline_mode<synchronous>, transform_indices = @transform_7, window_bounds = array<i64: 3, 4, 128>}, {pipeline_mode = #tpu.pipeline_mode<synchronous>, transform_indices = @transform_8, window_bounds = array<i64: 1, 128>}, {pipeline_mode = #tpu.pipeline_mode<synchronous>, transform_indices = @transform_9, window_bounds = array<i64: 1, 128>}, {transform_indices = @transform_10, window_bounds = array<i64: 1, 1, 64, 128>}]} {
    %cst = arith.constant 0.000000e+00 : f32
    %0 = vector.broadcast %cst : f32 to vector<64x128xf32>
    %c0 = arith.constant 0 : index
    %c0_0 = arith.constant 0 : index
    %c0_1 = arith.constant 0 : index
    %c0_2 = arith.constant 0 : index
    %c0_3 = arith.constant 0 : index
    %c0_4 = arith.constant 0 : index
    %1 = vector.load %arg2[%c0, %c0_0, %c0_1, %c0_2, %c0_3, %c0_4] : memref<1x1x1x9x9x16xbf16, #tpu.memory_space<vmem>>, vector<1x1x1x8x8x16xbf16>
    %2 = vector.shape_cast %1 : vector<1x1x1x8x8x16xbf16> to vector<8x8x16xbf16>
    %3 = vector.shape_cast %2 : vector<8x8x16xbf16> to vector<64x16xbf16>
    %c0_5 = arith.constant 0 : index
    %c0_6 = arith.constant 0 : index
    %c0_7 = arith.constant 0 : index
    %4 = vector.load %arg5[%c0_5, %c0_6, %c0_7] : memref<3x16x128xbf16, #tpu.memory_space<vmem>>, vector<1x16x128xbf16>
    %5 = vector.shape_cast %4 : vector<1x16x128xbf16> to vector<16x128xbf16>
    %cst_8 = arith.constant dense<0.000000e+00> : vector<64x128xf32>
    %6 = tpu.matmul %3, %5, %cst_8 {dimension_numbers = #tpu.dot_dimension_numbers<[1], [0], [0], [1], [0, 0, 1, 1], [], []>} : vector<64x16xbf16>, vector<16x128xbf16>, vector<64x128xf32> -> vector<64x128xf32>
    %7 = arith.addf %0, %6 : vector<64x128xf32>
    %c0_9 = arith.constant 0 : index
    %c0_10 = arith.constant 0 : index
    %c0_11 = arith.constant 0 : index
    %c0_12 = arith.constant 0 : index
    %c1 = arith.constant 1 : index
    %c0_13 = arith.constant 0 : index
    %8 = vector.load %arg2[%c0_9, %c0_10, %c0_11, %c0_12, %c1, %c0_13] : memref<1x1x1x9x9x16xbf16, #tpu.memory_space<vmem>>, vector<1x1x1x8x8x4xbf16>
    %9 = vector.shape_cast %8 : vector<1x1x1x8x8x4xbf16> to vector<8x8x4xbf16>
    %10 = vector.shape_cast %9 : vector<8x8x4xbf16> to vector<64x4xbf16>
    %c0_14 = arith.constant 0 : index
    %c0_15 = arith.constant 0 : index
    %c0_16 = arith.constant 0 : index
    %11 = vector.load %arg6[%c0_14, %c0_15, %c0_16] : memref<3x4x128xbf16, #tpu.memory_space<vmem>>, vector<1x4x128xbf16>
    %12 = vector.shape_cast %11 : vector<1x4x128xbf16> to vector<4x128xbf16>
    %cst_17 = arith.constant dense<0.000000e+00> : vector<64x128xf32>
    %13 = tpu.matmul %10, %12, %cst_17 {dimension_numbers = #tpu.dot_dimension_numbers<[1], [0], [0], [1], [0, 0, 1, 1], [], []>} : vector<64x4xbf16>, vector<4x128xbf16>, vector<64x128xf32> -> vector<64x128xf32>
    %14 = arith.addf %7, %13 : vector<64x128xf32>
    %c0_18 = arith.constant 0 : index
    %c0_19 = arith.constant 0 : index
    %c0_20 = arith.constant 0 : index
    %c0_21 = arith.constant 0 : index
    %c1_22 = arith.constant 1 : index
    %c8 = arith.constant 8 : index
    %15 = vector.load %arg2[%c0_18, %c0_19, %c0_20, %c0_21, %c1_22, %c8] : memref<1x1x1x9x9x16xbf16, #tpu.memory_space<vmem>>, vector<1x1x1x8x8x4xbf16>
    %16 = vector.shape_cast %15 : vector<1x1x1x8x8x4xbf16> to vector<8x8x4xbf16>
    %17 = vector.shape_cast %16 : vector<8x8x4xbf16> to vector<64x4xbf16>
    %c0_23 = arith.constant 0 : index
    %c0_24 = arith.constant 0 : index
    %c0_25 = arith.constant 0 : index
    %18 = vector.load %arg7[%c0_23, %c0_24, %c0_25] : memref<3x4x128xbf16, #tpu.memory_space<vmem>>, vector<1x4x128xbf16>
    %19 = vector.shape_cast %18 : vector<1x4x128xbf16> to vector<4x128xbf16>
    %cst_26 = arith.constant dense<0.000000e+00> : vector<64x128xf32>
    %20 = tpu.matmul %17, %19, %cst_26 {dimension_numbers = #tpu.dot_dimension_numbers<[1], [0], [0], [1], [0, 0, 1, 1], [], []>} : vector<64x4xbf16>, vector<4x128xbf16>, vector<64x128xf32> -> vector<64x128xf32>
    %21 = arith.addf %14, %20 : vector<64x128xf32>
    %c0_27 = arith.constant 0 : index
    %c0_28 = arith.constant 0 : index
    %c0_29 = arith.constant 0 : index
    %c1_30 = arith.constant 1 : index
    %c0_31 = arith.constant 0 : index
    %c0_32 = arith.constant 0 : index
    %22 = vector.load %arg2[%c0_27, %c0_28, %c0_29, %c1_30, %c0_31, %c0_32] : memref<1x1x1x9x9x16xbf16, #tpu.memory_space<vmem>>, vector<1x1x1x8x8x8xbf16>
    %23 = vector.shape_cast %22 : vector<1x1x1x8x8x8xbf16> to vector<8x8x8xbf16>
    %24 = vector.shape_cast %23 : vector<8x8x8xbf16> to vector<64x8xbf16>
    %c0_33 = arith.constant 0 : index
    %c0_34 = arith.constant 0 : index
    %c0_35 = arith.constant 0 : index
    %25 = vector.load %arg8[%c0_33, %c0_34, %c0_35] : memref<3x8x128xbf16, #tpu.memory_space<vmem>>, vector<1x8x128xbf16>
    %26 = vector.shape_cast %25 : vector<1x8x128xbf16> to vector<8x128xbf16>
    %cst_36 = arith.constant dense<0.000000e+00> : vector<64x128xf32>
    %27 = tpu.matmul %24, %26, %cst_36 {dimension_numbers = #tpu.dot_dimension_numbers<[1], [0], [0], [1], [0, 0, 1, 1], [], []>} : vector<64x8xbf16>, vector<8x128xbf16>, vector<64x128xf32> -> vector<64x128xf32>
    %28 = arith.addf %21, %27 : vector<64x128xf32>
    %c0_37 = arith.constant 0 : index
    %c0_38 = arith.constant 0 : index
    %c0_39 = arith.constant 0 : index
    %c1_40 = arith.constant 1 : index
    %c1_41 = arith.constant 1 : index
    %c0_42 = arith.constant 0 : index
    %29 = vector.load %arg2[%c0_37, %c0_38, %c0_39, %c1_40, %c1_41, %c0_42] : memref<1x1x1x9x9x16xbf16, #tpu.memory_space<vmem>>, vector<1x1x1x8x8x4xbf16>
    %30 = vector.shape_cast %29 : vector<1x1x1x8x8x4xbf16> to vector<8x8x4xbf16>
    %31 = vector.shape_cast %30 : vector<8x8x4xbf16> to vector<64x4xbf16>
    %c0_43 = arith.constant 0 : index
    %c0_44 = arith.constant 0 : index
    %c0_45 = arith.constant 0 : index
    %32 = vector.load %arg9[%c0_43, %c0_44, %c0_45] : memref<3x4x128xbf16, #tpu.memory_space<vmem>>, vector<1x4x128xbf16>
    %33 = vector.shape_cast %32 : vector<1x4x128xbf16> to vector<4x128xbf16>
    %cst_46 = arith.constant dense<0.000000e+00> : vector<64x128xf32>
    %34 = tpu.matmul %31, %33, %cst_46 {dimension_numbers = #tpu.dot_dimension_numbers<[1], [0], [0], [1], [0, 0, 1, 1], [], []>} : vector<64x4xbf16>, vector<4x128xbf16>, vector<64x128xf32> -> vector<64x128xf32>
    %35 = arith.addf %28, %34 : vector<64x128xf32>
    %c0_47 = arith.constant 0 : index
    %c0_48 = arith.constant 0 : index
    %c0_49 = arith.constant 0 : index
    %c0_50 = arith.constant 0 : index
    %c0_51 = arith.constant 0 : index
    %c0_52 = arith.constant 0 : index
    %36 = vector.load %arg3[%c0_47, %c0_48, %c0_49, %c0_50, %c0_51, %c0_52] : memref<1x1x1x9x9x16xbf16, #tpu.memory_space<vmem>>, vector<1x1x1x8x8x16xbf16>
    %37 = vector.shape_cast %36 : vector<1x1x1x8x8x16xbf16> to vector<8x8x16xbf16>
    %38 = vector.shape_cast %37 : vector<8x8x16xbf16> to vector<64x16xbf16>
    %c1_53 = arith.constant 1 : index
    %c0_54 = arith.constant 0 : index
    %c0_55 = arith.constant 0 : index
    %39 = vector.load %arg5[%c1_53, %c0_54, %c0_55] : memref<3x16x128xbf16, #tpu.memory_space<vmem>>, vector<1x16x128xbf16>
    %40 = vector.shape_cast %39 : vector<1x16x128xbf16> to vector<16x128xbf16>
    %cst_56 = arith.constant dense<0.000000e+00> : vector<64x128xf32>
    %41 = tpu.matmul %38, %40, %cst_56 {dimension_numbers = #tpu.dot_dimension_numbers<[1], [0], [0], [1], [0, 0, 1, 1], [], []>} : vector<64x16xbf16>, vector<16x128xbf16>, vector<64x128xf32> -> vector<64x128xf32>
    %42 = arith.addf %35, %41 : vector<64x128xf32>
    %c0_57 = arith.constant 0 : index
    %c0_58 = arith.constant 0 : index
    %c0_59 = arith.constant 0 : index
    %c0_60 = arith.constant 0 : index
    %c1_61 = arith.constant 1 : index
    %c0_62 = arith.constant 0 : index
    %43 = vector.load %arg3[%c0_57, %c0_58, %c0_59, %c0_60, %c1_61, %c0_62] : memref<1x1x1x9x9x16xbf16, #tpu.memory_space<vmem>>, vector<1x1x1x8x8x4xbf16>
    %44 = vector.shape_cast %43 : vector<1x1x1x8x8x4xbf16> to vector<8x8x4xbf16>
    %45 = vector.shape_cast %44 : vector<8x8x4xbf16> to vector<64x4xbf16>
    %c1_63 = arith.constant 1 : index
    %c0_64 = arith.constant 0 : index
    %c0_65 = arith.constant 0 : index
    %46 = vector.load %arg6[%c1_63, %c0_64, %c0_65] : memref<3x4x128xbf16, #tpu.memory_space<vmem>>, vector<1x4x128xbf16>
    %47 = vector.shape_cast %46 : vector<1x4x128xbf16> to vector<4x128xbf16>
    %cst_66 = arith.constant dense<0.000000e+00> : vector<64x128xf32>
    %48 = tpu.matmul %45, %47, %cst_66 {dimension_numbers = #tpu.dot_dimension_numbers<[1], [0], [0], [1], [0, 0, 1, 1], [], []>} : vector<64x4xbf16>, vector<4x128xbf16>, vector<64x128xf32> -> vector<64x128xf32>
    %49 = arith.addf %42, %48 : vector<64x128xf32>
    %c0_67 = arith.constant 0 : index
    %c0_68 = arith.constant 0 : index
    %c0_69 = arith.constant 0 : index
    %c0_70 = arith.constant 0 : index
    %c1_71 = arith.constant 1 : index
    %c8_72 = arith.constant 8 : index
    %50 = vector.load %arg3[%c0_67, %c0_68, %c0_69, %c0_70, %c1_71, %c8_72] : memref<1x1x1x9x9x16xbf16, #tpu.memory_space<vmem>>, vector<1x1x1x8x8x4xbf16>
    %51 = vector.shape_cast %50 : vector<1x1x1x8x8x4xbf16> to vector<8x8x4xbf16>
    %52 = vector.shape_cast %51 : vector<8x8x4xbf16> to vector<64x4xbf16>
    %c1_73 = arith.constant 1 : index
    %c0_74 = arith.constant 0 : index
    %c0_75 = arith.constant 0 : index
    %53 = vector.load %arg7[%c1_73, %c0_74, %c0_75] : memref<3x4x128xbf16, #tpu.memory_space<vmem>>, vector<1x4x128xbf16>
    %54 = vector.shape_cast %53 : vector<1x4x128xbf16> to vector<4x128xbf16>
    %cst_76 = arith.constant dense<0.000000e+00> : vector<64x128xf32>
    %55 = tpu.matmul %52, %54, %cst_76 {dimension_numbers = #tpu.dot_dimension_numbers<[1], [0], [0], [1], [0, 0, 1, 1], [], []>} : vector<64x4xbf16>, vector<4x128xbf16>, vector<64x128xf32> -> vector<64x128xf32>
    %56 = arith.addf %49, %55 : vector<64x128xf32>
    %c0_77 = arith.constant 0 : index
    %c0_78 = arith.constant 0 : index
    %c0_79 = arith.constant 0 : index
    %c1_80 = arith.constant 1 : index
    %c0_81 = arith.constant 0 : index
    %c0_82 = arith.constant 0 : index
    %57 = vector.load %arg3[%c0_77, %c0_78, %c0_79, %c1_80, %c0_81, %c0_82] : memref<1x1x1x9x9x16xbf16, #tpu.memory_space<vmem>>, vector<1x1x1x8x8x8xbf16>
    %58 = vector.shape_cast %57 : vector<1x1x1x8x8x8xbf16> to vector<8x8x8xbf16>
    %59 = vector.shape_cast %58 : vector<8x8x8xbf16> to vector<64x8xbf16>
    %c1_83 = arith.constant 1 : index
    %c0_84 = arith.constant 0 : index
    %c0_85 = arith.constant 0 : index
    %60 = vector.load %arg8[%c1_83, %c0_84, %c0_85] : memref<3x8x128xbf16, #tpu.memory_space<vmem>>, vector<1x8x128xbf16>
    %61 = vector.shape_cast %60 : vector<1x8x128xbf16> to vector<8x128xbf16>
    %cst_86 = arith.constant dense<0.000000e+00> : vector<64x128xf32>
    %62 = tpu.matmul %59, %61, %cst_86 {dimension_numbers = #tpu.dot_dimension_numbers<[1], [0], [0], [1], [0, 0, 1, 1], [], []>} : vector<64x8xbf16>, vector<8x128xbf16>, vector<64x128xf32> -> vector<64x128xf32>
    %63 = arith.addf %56, %62 : vector<64x128xf32>
    %c0_87 = arith.constant 0 : index
    %c0_88 = arith.constant 0 : index
    %c0_89 = arith.constant 0 : index
    %c1_90 = arith.constant 1 : index
    %c1_91 = arith.constant 1 : index
    %c0_92 = arith.constant 0 : index
    %64 = vector.load %arg3[%c0_87, %c0_88, %c0_89, %c1_90, %c1_91, %c0_92] : memref<1x1x1x9x9x16xbf16, #tpu.memory_space<vmem>>, vector<1x1x1x8x8x4xbf16>
    %65 = vector.shape_cast %64 : vector<1x1x1x8x8x4xbf16> to vector<8x8x4xbf16>
    %66 = vector.shape_cast %65 : vector<8x8x4xbf16> to vector<64x4xbf16>
    %c1_93 = arith.constant 1 : index
    %c0_94 = arith.constant 0 : index
    %c0_95 = arith.constant 0 : index
    %67 = vector.load %arg9[%c1_93, %c0_94, %c0_95] : memref<3x4x128xbf16, #tpu.memory_space<vmem>>, vector<1x4x128xbf16>
    %68 = vector.shape_cast %67 : vector<1x4x128xbf16> to vector<4x128xbf16>
    %cst_96 = arith.constant dense<0.000000e+00> : vector<64x128xf32>
    %69 = tpu.matmul %66, %68, %cst_96 {dimension_numbers = #tpu.dot_dimension_numbers<[1], [0], [0], [1], [0, 0, 1, 1], [], []>} : vector<64x4xbf16>, vector<4x128xbf16>, vector<64x128xf32> -> vector<64x128xf32>
    %70 = arith.addf %63, %69 : vector<64x128xf32>
    %c0_97 = arith.constant 0 : index
    %c0_98 = arith.constant 0 : index
    %c0_99 = arith.constant 0 : index
    %c0_100 = arith.constant 0 : index
    %c0_101 = arith.constant 0 : index
    %c0_102 = arith.constant 0 : index
    %71 = vector.load %arg4[%c0_97, %c0_98, %c0_99, %c0_100, %c0_101, %c0_102] : memref<1x1x1x9x9x16xbf16, #tpu.memory_space<vmem>>, vector<1x1x1x8x8x16xbf16>
    %72 = vector.shape_cast %71 : vector<1x1x1x8x8x16xbf16> to vector<8x8x16xbf16>
    %73 = vector.shape_cast %72 : vector<8x8x16xbf16> to vector<64x16xbf16>
    %c2 = arith.constant 2 : index
    %c0_103 = arith.constant 0 : index
    %c0_104 = arith.constant 0 : index
    %74 = vector.load %arg5[%c2, %c0_103, %c0_104] : memref<3x16x128xbf16, #tpu.memory_space<vmem>>, vector<1x16x128xbf16>
    %75 = vector.shape_cast %74 : vector<1x16x128xbf16> to vector<16x128xbf16>
    %cst_105 = arith.constant dense<0.000000e+00> : vector<64x128xf32>
    %76 = tpu.matmul %73, %75, %cst_105 {dimension_numbers = #tpu.dot_dimension_numbers<[1], [0], [0], [1], [0, 0, 1, 1], [], []>} : vector<64x16xbf16>, vector<16x128xbf16>, vector<64x128xf32> -> vector<64x128xf32>
    %77 = arith.addf %70, %76 : vector<64x128xf32>
    %c0_106 = arith.constant 0 : index
    %c0_107 = arith.constant 0 : index
    %c0_108 = arith.constant 0 : index
    %c0_109 = arith.constant 0 : index
    %c1_110 = arith.constant 1 : index
    %c0_111 = arith.constant 0 : index
    %78 = vector.load %arg4[%c0_106, %c0_107, %c0_108, %c0_109, %c1_110, %c0_111] : memref<1x1x1x9x9x16xbf16, #tpu.memory_space<vmem>>, vector<1x1x1x8x8x4xbf16>
    %79 = vector.shape_cast %78 : vector<1x1x1x8x8x4xbf16> to vector<8x8x4xbf16>
    %80 = vector.shape_cast %79 : vector<8x8x4xbf16> to vector<64x4xbf16>
    %c2_112 = arith.constant 2 : index
    %c0_113 = arith.constant 0 : index
    %c0_114 = arith.constant 0 : index
    %81 = vector.load %arg6[%c2_112, %c0_113, %c0_114] : memref<3x4x128xbf16, #tpu.memory_space<vmem>>, vector<1x4x128xbf16>
    %82 = vector.shape_cast %81 : vector<1x4x128xbf16> to vector<4x128xbf16>
    %cst_115 = arith.constant dense<0.000000e+00> : vector<64x128xf32>
    %83 = tpu.matmul %80, %82, %cst_115 {dimension_numbers = #tpu.dot_dimension_numbers<[1], [0], [0], [1], [0, 0, 1, 1], [], []>} : vector<64x4xbf16>, vector<4x128xbf16>, vector<64x128xf32> -> vector<64x128xf32>
    %84 = arith.addf %77, %83 : vector<64x128xf32>
    %c0_116 = arith.constant 0 : index
    %c0_117 = arith.constant 0 : index
    %c0_118 = arith.constant 0 : index
    %c0_119 = arith.constant 0 : index
    %c1_120 = arith.constant 1 : index
    %c8_121 = arith.constant 8 : index
    %85 = vector.load %arg4[%c0_116, %c0_117, %c0_118, %c0_119, %c1_120, %c8_121] : memref<1x1x1x9x9x16xbf16, #tpu.memory_space<vmem>>, vector<1x1x1x8x8x4xbf16>
    %86 = vector.shape_cast %85 : vector<1x1x1x8x8x4xbf16> to vector<8x8x4xbf16>
    %87 = vector.shape_cast %86 : vector<8x8x4xbf16> to vector<64x4xbf16>
    %c2_122 = arith.constant 2 : index
    %c0_123 = arith.constant 0 : index
    %c0_124 = arith.constant 0 : index
    %88 = vector.load %arg7[%c2_122, %c0_123, %c0_124] : memref<3x4x128xbf16, #tpu.memory_space<vmem>>, vector<1x4x128xbf16>
    %89 = vector.shape_cast %88 : vector<1x4x128xbf16> to vector<4x128xbf16>
    %cst_125 = arith.constant dense<0.000000e+00> : vector<64x128xf32>
    %90 = tpu.matmul %87, %89, %cst_125 {dimension_numbers = #tpu.dot_dimension_numbers<[1], [0], [0], [1], [0, 0, 1, 1], [], []>} : vector<64x4xbf16>, vector<4x128xbf16>, vector<64x128xf32> -> vector<64x128xf32>
    %91 = arith.addf %84, %90 : vector<64x128xf32>
    %c0_126 = arith.constant 0 : index
    %c0_127 = arith.constant 0 : index
    %c0_128 = arith.constant 0 : index
    %c1_129 = arith.constant 1 : index
    %c0_130 = arith.constant 0 : index
    %c0_131 = arith.constant 0 : index
    %92 = vector.load %arg4[%c0_126, %c0_127, %c0_128, %c1_129, %c0_130, %c0_131] : memref<1x1x1x9x9x16xbf16, #tpu.memory_space<vmem>>, vector<1x1x1x8x8x8xbf16>
    %93 = vector.shape_cast %92 : vector<1x1x1x8x8x8xbf16> to vector<8x8x8xbf16>
    %94 = vector.shape_cast %93 : vector<8x8x8xbf16> to vector<64x8xbf16>
    %c2_132 = arith.constant 2 : index
    %c0_133 = arith.constant 0 : index
    %c0_134 = arith.constant 0 : index
    %95 = vector.load %arg8[%c2_132, %c0_133, %c0_134] : memref<3x8x128xbf16, #tpu.memory_space<vmem>>, vector<1x8x128xbf16>
    %96 = vector.shape_cast %95 : vector<1x8x128xbf16> to vector<8x128xbf16>
    %cst_135 = arith.constant dense<0.000000e+00> : vector<64x128xf32>
    %97 = tpu.matmul %94, %96, %cst_135 {dimension_numbers = #tpu.dot_dimension_numbers<[1], [0], [0], [1], [0, 0, 1, 1], [], []>} : vector<64x8xbf16>, vector<8x128xbf16>, vector<64x128xf32> -> vector<64x128xf32>
    %98 = arith.addf %91, %97 : vector<64x128xf32>
    %c0_136 = arith.constant 0 : index
    %c0_137 = arith.constant 0 : index
    %c0_138 = arith.constant 0 : index
    %c1_139 = arith.constant 1 : index
    %c1_140 = arith.constant 1 : index
    %c0_141 = arith.constant 0 : index
    %99 = vector.load %arg4[%c0_136, %c0_137, %c0_138, %c1_139, %c1_140, %c0_141] : memref<1x1x1x9x9x16xbf16, #tpu.memory_space<vmem>>, vector<1x1x1x8x8x4xbf16>
    %100 = vector.shape_cast %99 : vector<1x1x1x8x8x4xbf16> to vector<8x8x4xbf16>
    %101 = vector.shape_cast %100 : vector<8x8x4xbf16> to vector<64x4xbf16>
    %c2_142 = arith.constant 2 : index
    %c0_143 = arith.constant 0 : index
    %c0_144 = arith.constant 0 : index
    %102 = vector.load %arg9[%c2_142, %c0_143, %c0_144] : memref<3x4x128xbf16, #tpu.memory_space<vmem>>, vector<1x4x128xbf16>
    %103 = vector.shape_cast %102 : vector<1x4x128xbf16> to vector<4x128xbf16>
    %cst_145 = arith.constant dense<0.000000e+00> : vector<64x128xf32>
    %104 = tpu.matmul %101, %103, %cst_145 {dimension_numbers = #tpu.dot_dimension_numbers<[1], [0], [0], [1], [0, 0, 1, 1], [], []>} : vector<64x4xbf16>, vector<4x128xbf16>, vector<64x128xf32> -> vector<64x128xf32>
    %105 = arith.addf %98, %104 : vector<64x128xf32>
    %cst_146 = arith.constant dense<0.000000e+00> : vector<64xf32>
    %106 = vector.multi_reduction <add>, %105, %cst_146 [1] : vector<64x128xf32> to vector<64xf32>
    %107 = vector.shape_cast %106 : vector<64xf32> to vector<64x1xf32>
    %cst_147 = arith.constant 1.250000e-01 : f32
    %108 = vector.broadcast %cst_147 : f32 to vector<64x1xf32>
    %109 = arith.mulf %107, %108 : vector<64x1xf32>
    %110 = vector.broadcast %109 : vector<64x1xf32> to vector<64x128xf32>
    %111 = arith.subf %105, %110 : vector<64x128xf32>
    %112 = tpu.iota {dimensions = array<i32: 1>} : vector<1x128xi32>
    %c8_i32 = arith.constant 8 : i32
    %113 = vector.broadcast %c8_i32 : i32 to vector<1x128xi32>
    %114 = arith.cmpi slt, %112, %113 : vector<1x128xi32>
    %cst_148 = arith.constant 0.000000e+00 : f32
    %115 = vector.shape_cast %114 : vector<1x128xi1> to vector<1x128xi1>
    %116 = vector.broadcast %115 : vector<1x128xi1> to vector<64x128xi1>
    %117 = vector.broadcast %cst_148 : f32 to vector<64x128xf32>
    %118 = arith.select %116, %111, %117 : vector<64x128xi1>, vector<64x128xf32>
    %119 = arith.mulf %118, %118 : vector<64x128xf32>
    %cst_149 = arith.constant dense<0.000000e+00> : vector<64xf32>
    %120 = vector.multi_reduction <add>, %119, %cst_149 [1] : vector<64x128xf32> to vector<64xf32>
    %121 = vector.shape_cast %120 : vector<64xf32> to vector<64x1xf32>
    %cst_150 = arith.constant 1.250000e-01 : f32
    %122 = vector.broadcast %cst_150 : f32 to vector<64x1xf32>
    %123 = arith.mulf %121, %122 : vector<64x1xf32>
    %cst_151 = arith.constant 9.99999974E-6 : f32
    %124 = vector.broadcast %cst_151 : f32 to vector<64x1xf32>
    %125 = arith.addf %123, %124 : vector<64x1xf32>
    %126 = math.rsqrt %125 : vector<64x1xf32>
    %127 = vector.broadcast %126 : vector<64x1xf32> to vector<64x128xf32>
    %128 = arith.mulf %118, %127 : vector<64x128xf32>
    %c0_152 = arith.constant 0 : index
    %c0_153 = arith.constant 0 : index
    %129 = vector.load %arg10[%c0_152, %c0_153] : memref<1x128xf32, #tpu.memory_space<vmem>>, vector<1x128xf32>
    %130 = vector.broadcast %129 : vector<1x128xf32> to vector<64x128xf32>
    %131 = arith.mulf %128, %130 : vector<64x128xf32>
    %c0_154 = arith.constant 0 : index
    %c0_155 = arith.constant 0 : index
    %132 = vector.load %arg11[%c0_154, %c0_155] : memref<1x128xf32, #tpu.memory_space<vmem>>, vector<1x128xf32>
    %133 = vector.broadcast %132 : vector<1x128xf32> to vector<64x128xf32>
    %134 = arith.addf %131, %133 : vector<64x128xf32>
    %c0_156 = arith.constant 0 : index
    %c0_157 = arith.constant 0 : index
    %c0_158 = arith.constant 0 : index
    %c0_159 = arith.constant 0 : index
    %135 = vector.load %arg12[%c0_156, %c0_157, %c0_158, %c0_159] : memref<1x1x64x128xf32, #tpu.memory_space<vmem>>, vector<1x1x64x128xf32>
    %136 = vector.shape_cast %135 : vector<1x1x64x128xf32> to vector<64x128xf32>
    %137 = vector.shape_cast %134 : vector<64x128xf32> to vector<1x1x64x128xf32>
    tpu.vector_store %arg12[%c0_156, %c0_157, %c0_158, %c0_159], %137 {strides = array<i32>} : memref<1x1x64x128xf32, #tpu.memory_space<vmem>>, vector<1x1x64x128xf32>,
    return
  }
  func.func @transform_0(%arg0: i32, %arg1: i32) -> (i32, i32, i32, i32, i32, i32) {
    %c0_i32 = arith.constant 0 : i32
    %0 = arith.addi %arg1, %c0_i32 : i32
    %c0_i32_0 = arith.constant 0 : i32
    %c0_i32_1 = arith.constant 0 : i32
    %c0_i32_2 = arith.constant 0 : i32
    %c0_i32_3 = arith.constant 0 : i32
    %c0_i32_4 = arith.constant 0 : i32
    return %arg0, %0, %c0_i32_0, %c0_i32_1, %c0_i32_2, %c0_i32_3 : i32, i32, i32, i32, i32, i32
  }
  func.func @transform_1(%arg0: i32, %arg1: i32) -> (i32, i32, i32, i32, i32, i32) {
    %c0_i32 = arith.constant 0 : i32
    %0 = arith.addi %arg1, %c0_i32 : i32
    %c1_i32 = arith.constant 1 : i32
    %c0_i32_0 = arith.constant 0 : i32
    %c0_i32_1 = arith.constant 0 : i32
    %c0_i32_2 = arith.constant 0 : i32
    %c0_i32_3 = arith.constant 0 : i32
    return %arg0, %0, %c1_i32, %c0_i32_0, %c0_i32_1, %c0_i32_2 : i32, i32, i32, i32, i32, i32
  }
  func.func @transform_2(%arg0: i32, %arg1: i32) -> (i32, i32, i32, i32, i32, i32) {
    %c1_i32 = arith.constant 1 : i32
    %0 = arith.addi %arg1, %c1_i32 : i32
    %c0_i32 = arith.constant 0 : i32
    %c0_i32_0 = arith.constant 0 : i32
    %c0_i32_1 = arith.constant 0 : i32
    %c0_i32_2 = arith.constant 0 : i32
    %c0_i32_3 = arith.constant 0 : i32
    return %arg0, %0, %c0_i32, %c0_i32_0, %c0_i32_1, %c0_i32_2 : i32, i32, i32, i32, i32, i32
  }
  func.func @transform_3(%arg0: i32, %arg1: i32) -> (i32, i32, i32) {
    %c0_i32 = arith.constant 0 : i32
    %c0_i32_0 = arith.constant 0 : i32
    %c0_i32_1 = arith.constant 0 : i32
    %c0_i32_2 = arith.constant 0 : i32
    return %c0_i32, %c0_i32_0, %c0_i32_1 : i32, i32, i32
  }
  func.func @transform_4(%arg0: i32, %arg1: i32) -> (i32, i32, i32) {
    %c0_i32 = arith.constant 0 : i32
    %c0_i32_0 = arith.constant 0 : i32
    %c0_i32_1 = arith.constant 0 : i32
    %c0_i32_2 = arith.constant 0 : i32
    return %c0_i32, %c0_i32_0, %c0_i32_1 : i32, i32, i32
  }
  func.func @transform_5(%arg0: i32, %arg1: i32) -> (i32, i32, i32) {
    %c0_i32 = arith.constant 0 : i32
    %c0_i32_0 = arith.constant 0 : i32
    %c0_i32_1 = arith.constant 0 : i32
    %c0_i32_2 = arith.constant 0 : i32
    return %c0_i32, %c0_i32_0, %c0_i32_1 : i32, i32, i32
  }
  func.func @transform_6(%arg0: i32, %arg1: i32) -> (i32, i32, i32) {
    %c0_i32 = arith.constant 0 : i32
    %c0_i32_0 = arith.constant 0 : i32
    %c0_i32_1 = arith.constant 0 : i32
    %c0_i32_2 = arith.constant 0 : i32
    return %c0_i32, %c0_i32_0, %c0_i32_1 : i32, i32, i32
  }
  func.func @transform_7(%arg0: i32, %arg1: i32) -> (i32, i32, i32) {
    %c0_i32 = arith.constant 0 : i32
    %c0_i32_0 = arith.constant 0 : i32
    %c0_i32_1 = arith.constant 0 : i32
    %c0_i32_2 = arith.constant 0 : i32
    return %c0_i32, %c0_i32_0, %c0_i32_1 : i32, i32, i32
  }
  func.func @transform_8(%arg0: i32, %arg1: i32) -> (i32, i32) {
    %c0_i32 = arith.constant 0 : i32
    %c0_i32_0 = arith.constant 0 : i32
    %c0_i32_1 = arith.constant 0 : i32
    return %c0_i32, %c0_i32_0 : i32, i32
  }
  func.func @transform_9(%arg0: i32, %arg1: i32) -> (i32, i32) {
    %c0_i32 = arith.constant 0 : i32
    %c0_i32_0 = arith.constant 0 : i32
    %c0_i32_1 = arith.constant 0 : i32
    return %c0_i32, %c0_i32_0 : i32, i32
  }
  func.func @transform_10(%arg0: i32, %arg1: i32) -> (i32, i32, i32, i32) {
    %c0_i32 = arith.constant 0 : i32
    %c0_i32_0 = arith.constant 0 : i32
    %c0_i32_1 = arith.constant 0 : i32
    return %arg0, %arg1, %c0_i32, %c0_i32_0 : i32, i32, i32, i32
  }
}

</mosaic_0001>

<bundles_post_ra>
// kernel: downsample_forward.1
= control target key start
LH: loop header
LB: loop body
LE: loop exit
PB: predicated region body
PF: predicated region fallthrough
CT: control target
= control target key end

     0   :  { %15 = vsyncpa [#allocation3], 0  ;;  %s4726_s0 = inlined_call_operand.vmem [shape: bf16[2,5,2,9,9,16], index: 0, kind: input, shape index: {}, may-alias: {0,1,2}]   ;;  %s4727_s1 = inlined_call_operand.vmem [shape: bf16[2,5,2,9,9,16], index: 1, kind: input, shape index: {}, may-alias: {0,1,2}]   ;;  %s4728_s2 = inlined_call_operand.vmem [shape: bf16[2,5,2,9,9,16], index: 2, kind: input, shape index: {}, may-alias: {0,1,2}]   ;;  %s4729_s3 = inlined_call_operand.vmem [shape: bf16[3,16,128], index: 3, kind: input, shape index: {}]   ;;  %s4730_s4 = inlined_call_operand.vmem [shape: bf16[3,4,128], index: 4, kind: input, shape index: {}]   ;;  %s4731_s5 = inlined_call_operand.vmem [shape: bf16[3,4,128], index: 5, kind: input, shape index: {}]   ;;  %s4732_s6 = inlined_call_operand.vmem [shape: bf16[3,8,128], index: 6, kind: input, shape index: {}]   ;;  %s4733_s7 = inlined_call_operand.vmem [shape: bf16[3,4,128], index: 7, kind: input, shape index: {}]   ;;  %s4734_s8 = inlined_call_operand.vmem [shape: f32[1,128], index: 8, kind: input, shape index: {}]   ;;  %s4735_s9 = inlined_call_operand.vmem [shape: f32[1,128], index: 9, kind: input, shape index: {}]   ;;  %s4736_s10 = inlined_call_operand.hbm [shape: f32[2,4,64,128], index: 10, kind: output, shape index: {}]  }
   0x1   :  { %17 = vsyncpa [#allocation3 + $0x1], 0  ;;  %s3991_s13 = smov 0   ;;  %s3993_s14 = smov 0  }
   0x2   :  { %s3995_s15 = smov 0   ;;  %s3997_s16 = smov 0  }
   0x3   :  { %s3999_s17 = smov 0   ;;  %s4001_s18 = smov 0  }
   0x4   :  { %s4003_s19 = smov 0   ;;  %s4005_s20 = smov 0  }
   0x5 LB: > { %4741 = sst [smem:[#allocation5_spill]] %s3922_s18  ;;  %s3127_s21 = sadd.s32 4294967295, %s3930_s20   ;;  %s3930_s20 = sphi %s4005_s20, %s23_s20   ;;  %s3926_s19 = sphi %s4003_s19, %s4755_s19   ;;  %s3922_s18 = sphi %s4001_s18, %s4754_s18   ;;  %s3918_s17 = sphi %s3999_s17, %s4753_s17   ;;  %s3914_s16 = sphi %s3997_s16, %s4752_s16   ;;  %s3910_s15 = sphi %s3995_s15, %s4758_s15   ;;  %s3906_s14 = sphi %s3993_s14, %s4757_s14   ;;  %s3902_s13 = sphi %s3991_s13, %s4756_s13  }
   0x6   : > { %4742 = sst [smem:[#allocation6_spill]] %s3926_s19  ;;  %s3128_s22 = sadd.s32 4294967294, %s3930_s20  }
   0x7   : > { %s32_s23 = sadd.s32 1, %s3922_s18  ;;  %s35_s24 = sadd.s32 1, %s3926_s19 }
   0x8   : > { %p33_p0 = scmp.ge.s32.totalorder %s32_s23, 4  ;;  %p287_p1 = scmp.ne.s32.totalorder %s3910_s15, %s3906_s14 }
   0x9   : > { %p288_p2 = scmp.eq.s32.totalorder %s3127_s21, 7  ;;  %p293_p5 = scmp.ne.s32.totalorder %s3906_s14, %s3902_s13 }
   0xa   : > { %s4760_s23 = smov (%p33_p0, %s32_s23), 0  ;;  %s4762_s24 = smov (!%p33_p0, %s35_s24), %s3926_s19 }
   0xb   : > { %4743 = sst [smem:[#allocation7_spill]] %s4760_s23  ;;  %s273_s25 = ssub.s32 %s3922_s18, %s4760_s23 }
   0xc   : > { %p4042_p3 = por %p288_p2, %p287_p1  ;;  %p37_p4 = scmp.ge.s32.totalorder %s4762_s24, 2 }
   0xd   : > { %p294_p6 = scmp.eq.s32.totalorder %s3128_s22, 7  ;;  %p3131_p7 = scmp.ge.s32.totalorder %s3930_s20, 1 }
   0xe   : > { %s4764_s24 = smov (%p37_p4, %s4762_s24), 0  ;;  %p372_p9 = scmp.lt.s32.totalorder %s3930_s20, 9 }
   0xf   : > { %4745 = sst [smem:[#allocation8_spill]] %s4764_s24  ;;  %p4051_p8 = por %p294_p6, %p293_p5 }
  0x10   : > { %s272_s28 = ssub.s32 %s3926_s19, %s4764_s24  ;;  %s277_s29 = sadd.s32 1, %s3910_s15 }
  0x11   : > { %s274_s30 = sor.u32 %s273_s25, %s272_s28  ;;  %p373_p10 = pnand %p3131_p7, %p372_p9 }
  0x12   : > { %p275_p11 = scmp.eq.s32.totalorder %s274_s30, 0  ;;  %p434_p12 = scmp.lt.s32.totalorder (!%p373_p10), %s3918_s17, 1  ;;  %v598_v0 = vld [vmem:[%s4730_s4] sm:$0x3] (!%p373_p10)  ;;  %vm624_vm0 = vcmask (!%p373_p10), 1041408   ;;  %vm611_vm3 = vcmask (!%p373_p10), 31744  }
  0x13   : > { %376 = sbr.rel (%p373_p10) target bundleno = 841 (0x349), region = 60  ;;  %p436_p13 = scmp.lt.s32.totalorder (!%p373_p10), %s3914_s16, 4  ;;  %3702 = vmatprep.subr.msk.bf16.mxu1 (!%p373_p10), %vm624_vm0, %v598_v0  ;;  %v626_v1 = vsel (!%p373_p10), %vm624_vm0, %v598_v0, 0  ;;  %v4076_v2 = vld [vmem:[%s4729_s3] sm:$0xff] (!%p373_p10)   ;;  %vm483_vm1 = vsmask.f32 (!%p373_p10), 3328 }
  0x14   : > { %s4060_s11 = scalar_select %p275_p11, %s3910_s15, %s277_s29  }
  0x15   : > { %3439 = vmatpush3.bf16.msra.mxu1 (!%p373_p10), %v626_v1  ;;  %v4081_v3 = vld [vmem:[%s4731_s5 + $0x2] sm:$0x3] (!%p373_p10)  ;;  %s453_s23 = sadd.s32 (!%p373_p10), 1, %s3914_s16  ;;  %vm484_vm2 = vsmask.f32 (!%p373_p10), 7440  ;;  %vm719_vm5 = vcmask (!%p373_p10), 130048  }
  0x16   : > { %4747 = sst [smem:[#allocation9_spill]] %s4060_s11  ;;  %3707 = vmatprep.subr.msk.bf16.mxu0 (!%p373_p10), %vm624_vm0, %v4081_v3  ;;  %3448 = vmatprep.subr.bf16.mxu1 (!%p373_p10), %v4076_v2  ;;  %p4092_p0 = scmp.lt.s32.totalorder (!%p373_p10), %s453_s23, 4  ;;  %vm4125_vm4 = vmor (!%p373_p10), %vm483_vm1, %vm484_vm2  ;;  %vm937_vm6 = vcmask (!%p373_p10), 1043456   ;;  %vm924_vm7 = vcmask (!%p373_p10), 64512  }
  0x1a   : > { %s4068_s22 = scalar_select %p434_p12, %s3918_s17, 1 }
  0x1b   : > { %s437_s25 = scalar_select %p436_p13, %s3914_s16, 4 }
  0x1c   : > { %s3716_s21 = smul.u32 180, %s4068_s22  ;;  %s4766_s23 = smov (!%p4092_p0, %s453_s23), 4 }
  0x1d   : > { %s3715_s24 = smul.u32 36, %s437_s25  ;;  %s3358_s25 = sshll.u32 %s3914_s16, 3 }
  0x1f   : > { %s440_s19 = sadd.s32 %s3716_s21, %s3715_s24  ;;  %s3932_s24 = smov 120  }
  0x20   : > { %s3133_s18 = sshll.u32 %s440_s19, 2 }
  0x21   : > { %s4099_s12 = scalar_lea.vmem %s4727_s1, %s3133_s18  ;;  %s4104_s19 = scalar_lea.vmem %s4726_s0, %s3133_s18 }
  0x22   : > { %v3216_v4 = vld [vmem:[%s4099_s12 + $0x48] sm:$0xf]  ;;  %v3217_v5 = vld [vmem:[%s4099_s12 + $0x4c] sm:$0x1]  ;;  %v3218_v6 = vld [vmem:[%s4099_s12 + $0x50] sm:$0xf] }
  0x23   : > { %v3219_v7 = vld [vmem:[%s4099_s12 + $0x54] sm:$0x1]  ;;  %v1382_v8 = vshrl.u32 %v3216_v4, 16  ;;  %v1385_v9 = vshll.u32 %v3216_v4, 16  ;;  %v1391_v10 = vshll.u32 %v3217_v5, 16  ;;  %v1396_v11 = vshrl.u32 %v3218_v6, 16 }
  0x24   : > { %v1399_v12 = vshll.u32 %v3218_v6, 16  ;;  %v1405_v13 = vshll.u32 %v3219_v7, 16  ;;  %v4111_v14 = vld [vmem:[%s4104_s19] sm:$0xf]  ;;  %v4114_v15 = vld [vmem:[%s4104_s19 + $0x8] sm:$0xf] }
  0x25   : > { %v1384_v16 = vrot.slane %v1382_v8, 4  ;;  %v1387_v17 = vrot.slane %v1385_v9, 5  ;;  %v1393_v18 = vrot.slane %v1391_v10, 5  ;;  %v1398_v19 = vrot.slane %v1396_v11, 4  ;;  %v475_v20 = vld [vmem:[%s4104_s19 + $0x4] sm:$0x1] }
  0x26   : > { %v1401_v21 = vrot.slane %v1399_v12, 5  ;;  %v1407_v22 = vrot.slane %v1405_v13, 5  ;;  %v476_v23 = vld [vmem:[%s4104_s19 + $0xc] sm:$0x1]  ;;  %v487_v24 = vshrl.u32 %v4111_v14, 16  ;;  %v490_v25 = vshll.u32 %v4111_v14, 16 }
  0x27   : > { %v1388_v26 = vor.u32 %v1387_v17, %v1384_v16  ;;  %v496_v27 = vshll.u32 %v475_v20, 16  ;;  %v501_v28 = vshrl.u32 %v4114_v15, 16  ;;  %v504_v29 = vshll.u32 %v4114_v15, 16  ;;  %v3220_v30 = vld [vmem:[%s4099_s12 + $0x58] sm:$0xf]  ;;  %s3717_s18 = smul.u32 36, %s4766_s23 }
  0x28   : > { %v1402_v32 = vor.u32 %v1401_v21, %v1398_v19  ;;  %v489_v33 = vrot.slane %v487_v24, 4  ;;  %v492_v34 = vrot.slane %v490_v25, 5  ;;  %v510_v35 = vshll.u32 %v476_v23, 16  ;;  %v3221_v36 = vld [vmem:[%s4099_s12 + $0x5c] sm:$0x1] }
  0x29   : > { %v1389_v37 = vrot.slane %v1388_v26, 4  ;;  %v498_v38 = vrot.slane %v496_v27, 5  ;;  %v503_v39 = vrot.slane %v501_v28, 4  ;;  %v506_v40 = vrot.slane %v504_v29, 5  ;;  %v3222_v41 = vld [vmem:[%s4099_s12 + $0x60] sm:$0xf]  ;;  %s4170_s23 = sadd.s32 %s3717_s18, %s3716_s21 }
  0x2a   : > { %v1403_v42 = vrot.slane %v1402_v32, 4  ;;  %v493_v43 = vor.u32 %v492_v34, %v489_v33  ;;  %v512_v44 = vrot.slane %v510_v35, 5  ;;  %v1410_v45 = vshrl.u32 %v3220_v30, 16  ;;  %v3223_v48 = vld [vmem:[%s4099_s12 + $0x64] sm:$0x1]  ;;  %s3135_s11 = sshll.u32 %s4170_s23, 2 }
  0x2b   : > { %v1394_v46 = vsel %vm4125_vm4, %v1389_v37, %v1393_v18  ;;  %v507_v47 = vor.u32 %v506_v40, %v503_v39  ;;  %v1413_v49 = vshll.u32 %v3220_v30, 16  ;;  %v1419_v50 = vshll.u32 %v3221_v36, 16  ;;  %v4143_v55 = vld [vmem:[%s4104_s19 + $0x10] sm:$0xf]  ;;  %v477_v60 = vld [vmem:[%s4104_s19 + $0x14] sm:$0x1]  ;;  %s4200_s28 = scalar_lea.vmem %s4728_s2, %s3135_s11 }
  0x2c   : > { %v1408_v51 = vsel %vm4125_vm4, %v1403_v42, %v1407_v22  ;;  %v494_v52 = vrot.slane %v493_v43, 4  ;;  %v1412_v53 = vrot.slane %v1410_v45, 4  ;;  %v1424_v54 = vshrl.u32 %v3222_v41, 16  ;;  %v4152_v1 = vld [vmem:[%s4104_s19 + $0x18] sm:$0xf]  ;;  %s3359_s18 = sshll.u32 %s3918_s17, 5 }
  0x2d   : > { %v4145_v56 = vcombine.low %v1394_v46, %v1408_v51  ;;  %v508_v57 = vrot.slane %v507_v47, 4  ;;  %v1415_v58 = vrot.slane %v1413_v49, 5  ;;  %v1421_v59 = vrot.slane %v1419_v50, 5  ;;  %v478_v6 = vld [vmem:[%s4104_s19 + $0x1c] sm:$0x1]  ;;  %s2993_s23 = sadd.s32 %s3359_s18, %s3358_s25  ;;  %s3933_s21 = smov [#allocation2]  }
  0x2e   : > { %v499_v61 = vsel %vm4125_vm4, %v494_v52, %v498_v38  ;;  %v1426_v62 = vrot.slane %v1424_v54, 4  ;;  %v1427_v63 = vshll.u32 %v3222_v41, 16  ;;  %v1433_v0 = vshll.u32 %v3223_v48, 16  ;;  %v4162_v12 = vld [vmem:[%s4104_s19 + $0x20] sm:$0xf]  ;;  %s3360_s16 = sshll.u32 %s2993_s23, 7 }
  0x2f   : > { %1597 = vrot.lane.b32.xlu0 %v4145_v56, %s3932_s24  ;;  %v513_v4 = vsel %vm4125_vm4, %v508_v57, %v512_v44  ;;  %v1416_v5 = vor.u32 %v1415_v58, %v1412_v53  ;;  %v515_v7 = vshrl.u32 %v4143_v55, 16  ;;  %v518_v8 = vshll.u32 %v4143_v55, 16  ;;  %v4166_v19 = vld [vmem:[%s4104_s19 + $0x28] sm:$0xf]  ;;  %v479_v24 = vld [vmem:[%s4104_s19 + $0x24] sm:$0x1] }
  0x30   : > { %v3136_v9 = vcombine.low %v499_v61, %v513_v4  ;;  %v1429_v10 = vrot.slane %v1427_v63, 5  ;;  %v524_v11 = vshll.u32 %v477_v60, 16  ;;  %v529_v18 = vshrl.u32 %v4152_v1, 16  ;;  %v480_v35 = vld [vmem:[%s4104_s19 + $0x2c] sm:$0x1]  ;;  %s3840_s29 = sshll.u32 %s3933_s21, 4  ;;  %s3841_s29 = int_to_ptr.vmem [resolvable:$false] %s3840_s29 }
  0x31   : > { %v1417_v13 = vrot.slane %v1416_v5, 4  ;;  %v517_v16 = vrot.slane %v515_v7, 4  ;;  %v520_v17 = vrot.slane %v518_v8, 5  ;;  %v1435_v21 = vrot.slane %v1433_v0, 5  ;;  %v4187_v43 = vld [vmem:[%s4104_s19 + $0x30] sm:$0xf] }
  0x32   : > { %798 = vrot.lane.b32.xlu1 %v3136_v9, %s3932_s24  ;;  %v1430_v20 = vor.u32 %v1429_v10, %v1426_v62  ;;  %v532_v22 = vshll.u32 %v4152_v1, 16  ;;  %v538_v23 = vshll.u32 %v478_v6, 16  ;;  %3440 = vmatprep.mubr.msk.bf16.mxu1 %vm611_vm3, %v3136_v9  ;;  %v526_v27 = vrot.slane %v524_v11, 5  ;;  %v481_v44 = vld [vmem:[%s4104_s19 + $0x34] sm:$0x1]  ;;  %s3842_s25 = scalar_lea.vmem %s3841_s29, 2048 }
  0x33   : > { %v1422_v25 = vsel %vm4125_vm4, %v1417_v13, %v1421_v59  ;;  %v521_v26 = vor.u32 %v520_v17, %v517_v16  ;;  %v531_v28 = vrot.slane %v529_v18, 4  ;;  %v543_v33 = vshrl.u32 %v4162_v12, 16  ;;  %v4195_v49 = vld [vmem:[%s4104_s19 + $0x38] sm:$0xf]  ;;  %v482_v63 = vld [vmem:[%s4104_s19 + $0x3c] sm:$0x1] }
  0x34   : > { %v1431_v29 = vrot.slane %v1430_v20, 4  ;;  %v534_v30 = vrot.slane %v532_v22, 5  ;;  %v540_v32 = vrot.slane %v538_v23, 5  ;;  %v546_v36 = vshll.u32 %v4162_v12, 16  ;;  %v2164_v4 = vld [vmem:[%s4200_s28] sm:$0xf] }
  0x35   : > { %v522_v34 = vrot.slane %v521_v26, 4  ;;  %v552_v37 = vshll.u32 %v479_v24, 16  ;;  %v557_v38 = vshrl.u32 %v4166_v19, 16  ;;  %v545_v41 = vrot.slane %v543_v33, 4  ;;  %v2165_v9 = vld [vmem:[%s4200_s28 + $0x4] sm:$0x1] }
  0x36   : > { %v1436_v39 = vsel %vm4125_vm4, %v1431_v29, %v1435_v21  ;;  %v535_v40 = vor.u32 %v534_v30, %v531_v28  ;;  %v560_v42 = vshll.u32 %v4166_v19, 16  ;;  %v548_v47 = vrot.slane %v546_v36, 5  ;;  %v2166_v21 = vld [vmem:[%s4200_s28 + $0x8] sm:$0xf]  ;;  %v2167_v22 = vld [vmem:[%s4200_s28 + $0xc] sm:$0x1] }
  0x37   : > { %v4190_v45 = vcombine.low %v1422_v25, %v1436_v39  ;;  %v527_v46 = vsel %vm4125_vm4, %v522_v34, %v526_v27  ;;  %v554_v48 = vrot.slane %v552_v37, 5  ;;  %v559_v51 = vrot.slane %v557_v38, 4  ;;  %v2168_v28 = vld [vmem:[%s4200_s28 + $0x10] sm:$0xf]  ;;  %v2169_v38 = vld [vmem:[%s4200_s28 + $0x14] sm:$0x1] }
  0x38   : > { %v536_v50 = vrot.slane %v535_v40, 4  ;;  %v562_v52 = vrot.slane %v560_v42, 5  ;;  %v566_v53 = vshll.u32 %v480_v35, 16  ;;  %v549_v54 = vor.u32 %v548_v47, %v545_v41  ;;  %v2170_v42 = vld [vmem:[%s4200_s28 + $0x18] sm:$0xf] }
  0x39   : > { %1599 = vrot.lane.b32.xlu0 %v4190_v45, %s3932_s24  ;;  %v571_v57 = vshrl.u32 %v4187_v43, 16  ;;  %v574_v58 = vshll.u32 %v4187_v43, 16  ;;  %v580_v59 = vshll.u32 %v481_v44, 16  ;;  %v585_v0 = vshrl.u32 %v4195_v49, 16 }
  0x3a   : > { %v541_v60 = vsel %vm4125_vm4, %v536_v50, %v540_v32  ;;  %v563_v61 = vor.u32 %v562_v52, %v559_v51  ;;  %v568_v62 = vrot.slane %v566_v53, 5  ;;  %v550_v6 = vrot.slane %v549_v54, 4  ;;  %v2171_v52 = vld [vmem:[%s4200_s28 + $0x1c] sm:$0x1] }
  0x3b   : > { %v3137_v5 = vcombine.low %v527_v46, %v541_v60  ;;  %v573_v7 = vrot.slane %v571_v57, 4  ;;  %v576_v8 = vrot.slane %v574_v58, 5  ;;  %v582_v11 = vrot.slane %v580_v59, 5 }
  0x3c   : > { %v564_v10 = vrot.slane %v563_v61, 4  ;;  %v587_v13 = vrot.slane %v585_v0, 4  ;;  %v588_v16 = vshll.u32 %v4195_v49, 16  ;;  %v555_v17 = vsel %vm4125_vm4, %v550_v6, %v554_v48  ;;  %v2172_v61 = vld [vmem:[%s4200_s28 + $0x20] sm:$0xf] }
  0x3d   : > { %800 = vrot.lane.b32.xlu1 %v3137_v5, %s3932_s24  ;;  %v577_v18 = vor.u32 %v576_v8, %v573_v7  ;;  %v594_v20 = vshll.u32 %v482_v63, 16  ;;  %v2181_v23 = vshrl.u32 %v2164_v4, 16  ;;  %3441 = vmatmul.mubr.msk.bf16.vlgmr.msra.gmra.mrb[0].mxu1 %vm611_vm3, %v3137_v5  ;;  %v2184_v26 = vshll.u32 %v2164_v4, 16  ;;  %v2173_v5 = vld [vmem:[%s4200_s28 + $0x24] sm:$0x1] }
  0x3e   : > { %v569_v24 = vsel %vm4125_vm4, %v564_v10, %v568_v62  ;;  %v590_v25 = vrot.slane %v588_v16, 5  ;;  %v2190_v27 = vshll.u32 %v2165_v9, 16  ;;  %3449 = vmatpush3.bf16.msra.mxu1 %v4076_v2  ;;  %v2195_v37 = vshrl.u32 %v2166_v21, 16  ;;  %v2174_v6 = vld [vmem:[%s4200_s28 + $0x28] sm:$0xf] }
  0x3f   : > { %v3138_v29 = vcombine.low %v555_v17, %v569_v24  ;;  %v578_v30 = vrot.slane %v577_v18, 4  ;;  %v596_v32 = vrot.slane %v594_v20, 5  ;;  %v2183_v33 = vrot.slane %v2181_v23, 4 }
  0x40   : > { %v591_v34 = vor.u32 %v590_v25, %v587_v13  ;;  %v2186_v35 = vrot.slane %v2184_v26, 5  ;;  %v2192_v36 = vrot.slane %v2190_v27, 5  ;;  %v2198_v40 = vshll.u32 %v2166_v21, 16  ;;  %v4241_v13 = vld [vmem:[%s4731_s5] sm:$0x3] }
  0x41   : > { %802 = vrot.lane.b32.xlu0 %v3138_v29, %s3932_s24  ;;  %v583_v39 = vsel %vm4125_vm4, %v578_v30, %v582_v11  ;;  %v2204_v41 = vshll.u32 %v2167_v22, 16  ;;  %v2209_v2 = vshrl.u32 %v2168_v28, 16  ;;  %3444 = vmatprep.mubr.msk.bf16.mxu1 %vm611_vm3, %v3138_v29  ;;  %v2197_v47 = vrot.slane %v2195_v37, 4  ;;  %v2175_v11 = vld [vmem:[%s4200_s28 + $0x2c] sm:$0x1] }
  0x42   : > { %v592_v44 = vrot.slane %v591_v34, 4  ;;  %v2187_v46 = vor.u32 %v2186_v35, %v2183_v33  ;;  %v2212_v48 = vshll.u32 %v2168_v28, 16  ;;  %v2200_v50 = vrot.slane %v2198_v40, 5  ;;  %v2176_v21 = vld [vmem:[%s4200_s28 + $0x30] sm:$0xf]  ;;  %3703 = vmatprep.subr.msk.bf16.mxu1 %vm624_vm0, %v4241_v13 }
  0x43   : > { %v2206_v51 = vrot.slane %v2204_v41, 5  ;;  %v2211_v53 = vrot.slane %v2209_v2, 4  ;;  %v2218_v54 = vshll.u32 %v2169_v38, 16  ;;  %v2223_v60 = vshrl.u32 %v2170_v42, 16  ;;  %v2177_v22 = vld [vmem:[%s4200_s28 + $0x34] sm:$0x1] }
  0x44   : > { %v597_v57 = vsel %vm4125_vm4, %v592_v44, %v596_v32  ;;  %v2188_v58 = vrot.slane %v2187_v46, 4  ;;  %v2214_v59 = vrot.slane %v2212_v48, 5  ;;  %v2201_v63 = vor.u32 %v2200_v50, %v2197_v47  ;;  %v2178_v32 = vld [vmem:[%s4200_s28 + $0x38] sm:$0xf]  ;;  %v2179_v40 = vld [vmem:[%s4200_s28 + $0x3c] sm:$0x1] }
  0x45   : > { %v3139_v62 = vcombine.low %v583_v39, %v597_v57  ;;  %v2220_v0 = vrot.slane %v2218_v54, 5  ;;  %v2226_v4 = vshll.u32 %v2170_v42, 16  ;;  %v2225_v9 = vrot.slane %v2223_v60, 4  ;;  %v3224_v41 = vld [vmem:[%s4099_s12 + $0x68] sm:$0xf] }
  0x46   : > { %v2193_v7 = vsel %vm4125_vm4, %v2188_v58, %v2192_v36  ;;  %v2215_v8 = vor.u32 %v2214_v59, %v2211_v53  ;;  %v2232_v10 = vshll.u32 %v2171_v52, 16  ;;  %v2202_v16 = vrot.slane %v2201_v63, 4  ;;  %v3225_v52 = vld [vmem:[%s4099_s12 + $0x6c] sm:$0x1]  ;;  %v3226_v53 = vld [vmem:[%s4099_s12 + $0x70] sm:$0xf] }
  0x47   : > { %804 = vrot.lane.b32.xlu1 %v3139_v62, %s3932_s24  ;;  %v2228_v17 = vrot.slane %v2226_v4, 5  ;;  %v2237_v18 = vshrl.u32 %v2172_v61, 16  ;;  %v2240_v20 = vshll.u32 %v2172_v61, 16  ;;  %3445 = vmatmul.mubr.msk.bf16.gmra.mrb[4].mxu1 %vm611_vm3, %v3139_v62  ;;  %v2246_v25 = vshll.u32 %v2173_v5, 16  ;;  %v3227_v5 = vld [vmem:[%s4099_s12 + $0x74] sm:$0x1] }
  0x48   : > { %v2216_v23 = vrot.slane %v2215_v8, 4  ;;  %v2234_v24 = vrot.slane %v2232_v10, 5  ;;  %v2251_v26 = vshrl.u32 %v2174_v6, 16  ;;  %v2207_v27 = vsel %vm4125_vm4, %v2202_v16, %v2206_v51  ;;  %v3228_v8 = vld [vmem:[%s4099_s12 + $0x78] sm:$0xf] }
  0x49   : > { %v2229_v28 = vor.u32 %v2228_v17, %v2225_v9  ;;  %v2239_v29 = vrot.slane %v2237_v18, 4  ;;  %v2242_v30 = vrot.slane %v2240_v20, 5  ;;  %v4252_v33 = vcombine.low %v2193_v7, %v2207_v27 }
  0x4a   : > { %v2221_v34 = vsel %vm4125_vm4, %v2216_v23, %v2220_v0  ;;  %v2253_v35 = vrot.slane %v2251_v26, 4  ;;  %v2254_v38 = vshll.u32 %v2174_v6, 16  ;;  %v2260_v39 = vshll.u32 %v2175_v11, 16 }
  0x4b   : > { %v2230_v36 = vrot.slane %v2229_v28, 4  ;;  %v2243_v37 = vor.u32 %v2242_v30, %v2239_v29  ;;  %2396 = vrot.lane.b32.xlu0 %v4252_v33, %s3932_s24  ;;  %v2265_v42 = vshrl.u32 %v2176_v21, 16  ;;  %v2268_v2 = vshll.u32 %v2176_v21, 16 }
  0x4c   : > { %v2274_v44 = vshll.u32 %v2177_v22, 16  ;;  %v2279_v46 = vshrl.u32 %v2178_v32, 16  ;;  %v2248_v50 = vrot.slane %v2246_v25, 5  ;;  %v2256_v51 = vrot.slane %v2254_v38, 5  ;;  %v3230_v22 = vld [vmem:[%s4099_s12 + $0x80] sm:$0xf] }
  0x4d   : > { %v2235_v47 = vsel %vm4125_vm4, %v2230_v36, %v2234_v24  ;;  %v2244_v48 = vrot.slane %v2243_v37, 4  ;;  %v2262_v57 = vrot.slane %v2260_v39, 5  ;;  %v2267_v58 = vrot.slane %v2265_v42, 4 }
  0x4e   : > { %v4264_v54 = vcombine.low %v2221_v34, %v2235_v47  ;;  %v2270_v59 = vrot.slane %v2268_v2, 5  ;;  %v2257_v60 = vor.u32 %v2256_v51, %v2253_v35  ;;  %v2276_v61 = vrot.slane %v2274_v44, 5 }
  0x4f   : > { %v2281_v62 = vrot.slane %v2279_v46, 4  ;;  %v2282_v63 = vshll.u32 %v2178_v32, 16  ;;  %v2288_v4 = vshll.u32 %v2179_v40, 16  ;;  %v1438_v6 = vshrl.u32 %v3224_v41, 16  ;;  %v3229_v32 = vld [vmem:[%s4099_s12 + $0x7c] sm:$0x1] }
  0x50   : > { %2398 = vrot.lane.b32.xlu1 %v4264_v54, %s3932_s24  ;;  %v2271_v0 = vor.u32 %v2270_v59, %v2267_v58  ;;  %v1441_v7 = vshll.u32 %v3224_v41, 16  ;;  %v2249_v9 = vsel %vm4125_vm4, %v2244_v48, %v2248_v50  ;;  %v2258_v10 = vrot.slane %v2257_v60, 4  ;;  %v3231_v41 = vld [vmem:[%s4099_s12 + $0x84] sm:$0x1] }
  0x51   : > { %v2284_v11 = vrot.slane %v2282_v63, 5  ;;  %v1452_v16 = vshrl.u32 %v3226_v53, 16  ;;  %v1440_v18 = vrot.slane %v1438_v6, 4  ;;  %v1447_v21 = vshll.u32 %v3225_v52, 16 }
  0x52   : > { %v2272_v17 = vrot.slane %v2271_v0, 4  ;;  %v1443_v20 = vrot.slane %v1441_v7, 5  ;;  %v2263_v23 = vsel %vm4125_vm4, %v2258_v10, %v2262_v57  ;;  %v2290_v25 = vrot.slane %v2288_v4, 5 }
  0x53   : > { %v2285_v24 = vor.u32 %v2284_v11, %v2281_v62  ;;  %v1454_v26 = vrot.slane %v1452_v16, 4  ;;  %v4275_v27 = vcombine.low %v2249_v9, %v2263_v23  ;;  %v1455_v30 = vshll.u32 %v3226_v53, 16  ;;  %v3263_v11 = vld [vmem:[%s4099_s12 + $0x50] sm:$0xf]  ;;  %v3265_v16 = vld [vmem:[%s4099_s12 + $0x58] sm:$0xf] }
  0x54   : > { %v2277_v28 = vsel %vm4125_vm4, %v2272_v17, %v2276_v61  ;;  %v1444_v29 = vor.u32 %v1443_v20, %v1440_v18  ;;  %v1461_v35 = vshll.u32 %v3227_v5, 16  ;;  %v1466_v36 = vshrl.u32 %v3228_v8, 16  ;;  %v3267_v23 = vld [vmem:[%s4099_s12 + $0x60] sm:$0xf] }
  0x55   : > { %v2286_v34 = vrot.slane %v2285_v24, 4  ;;  %v1469_v37 = vshll.u32 %v3228_v8, 16  ;;  %2400 = vrot.lane.b32.xlu0 %v4275_v27, %s3932_s24  ;;  %v1449_v39 = vrot.slane %v1447_v21, 5  ;;  %v1457_v40 = vrot.slane %v1455_v30, 5  ;;  %v3266_v30 = vld [vmem:[%s4099_s12 + $0x5c] sm:$0x1] }
  0x56   : > { %v1445_v38 = vrot.slane %v1444_v29, 4  ;;  %v1480_v42 = vshrl.u32 %v3230_v22, 16  ;;  %v1468_v44 = vrot.slane %v1466_v36, 4  ;;  %v1475_v47 = vshll.u32 %v3229_v32, 16 }
  0x57   : > { %v2291_v2 = vsel %vm4125_vm4, %v2286_v34, %v2290_v25  ;;  %v1471_v46 = vrot.slane %v1469_v37, 5  ;;  %v3145_v48 = vcombine.low %v4143_v55, %v4152_v1  ;;  %v1458_v51 = vor.u32 %v1457_v40, %v1454_v26  ;;  %v3254_v1 = vld [vmem:[%s4732_s6 + $0x4] sm:$0xf]  ;;  %v3264_v26 = vld [vmem:[%s4099_s12 + $0x54] sm:$0x1] }
  0x58   : > { %v4287_v50 = vcombine.low %v2277_v28, %v2291_v2  ;;  %v1463_v52 = vrot.slane %v1461_v35, 5  ;;  %v1482_v57 = vrot.slane %v1480_v42, 4  ;;  %v1483_v58 = vshll.u32 %v3230_v22, 16  ;;  %v3797_v40 = vld [vmem:[%s4099_s12 + $0x50] ss:$8 sps:$4 sm:$0xff]  }
  0x59   : > { %v1472_v53 = vor.u32 %v1471_v46, %v1468_v44  ;;  %v1489_v59 = vshll.u32 %v3231_v41, 16  ;;  %v1450_v60 = vsel %vm4125_vm4, %v1445_v38, %v1449_v39  ;;  %v1459_v61 = vrot.slane %v1458_v51, 4  ;;  %v3268_v39 = vld [vmem:[%s4099_s12 + $0x64] sm:$0x1]  ;;  %v3270_v42 = vld [vmem:[%s4099_s12 + $0x6c] sm:$0x1] }
  0x5a   : > { %2402 = vrot.lane.b32.xlu1 %v4287_v50, %s3932_s24  ;;  %v3144_v62 = vcombine.low %v4111_v14, %v4114_v15  ;;  %v3146_v55 = vcombine.low %v4162_v12, %v4166_v19  ;;  %v1477_v0 = vrot.slane %v1475_v47, 5  ;;  %v1485_v4 = vrot.slane %v1483_v58, 5  ;;  %v4313_v15 = vld [vmem:[%s4732_s6] sm:$0xf]  ;;  %v3173_v51 = vld [vmem:[%s4104_s19 + $0x8] sm:$0xf] }
  0x5b   : > { %v1473_v63 = vrot.slane %v1472_v53, 4  ;;  %v4302_v5 = vsel %vm624_vm0, %v4081_v3, 0  ;;  %v1464_v6 = vsel %vm4125_vm4, %v1459_v61, %v1463_v52  ;;  %v819_v14 = vsel %vm624_vm0, %v4241_v13, 0  ;;  %v3279_v58 = vld [vmem:[%s4733_s7 + $0x2] sm:$0x3] }
  0x5c   : > { %3450 = vmatprep.mubr.msk.bf16.mxu1 %vm719_vm5, %v3144_v62  ;;  %3509 = vmatpush3.bf16.msra.mxu0 %v4302_v5  ;;  %v4315_v12 = vcombine.low %v1450_v60, %v1464_v6  ;;  %v1486_v3 = vor.u32 %v1485_v4, %v1482_v57  ;;  %v1491_v19 = vrot.slane %v1489_v59, 5  ;;  %v3147_v9 = vcombine.low %v4187_v43, %v4195_v49  ;;  %v3269_v43 = vld [vmem:[%s4099_s12 + $0x68] sm:$0xf]  ;;  %v3175_v62 = vld [vmem:[%s4104_s19 + $0x10] sm:$0xf] }
  0x5d   : > { %3451 = vmatmul.mubr.msk.bf16.vlgmr.msra.gmra.mrb[0].mxu1 %vm719_vm5, %v3145_v48  ;;  %3709 = vmatprep.subr.msk.bf16.mxu0 %vm937_vm6, %v3254_v1  ;;  %v1478_v13 = vsel %vm4125_vm4, %v1473_v63, %v1477_v0  ;;  %v1829_v17 = vshrl.u32 %v3263_v11, 16  ;;  %v1832_v18 = vshll.u32 %v3263_v11, 16  ;;  %v1843_v20 = vshrl.u32 %v3265_v16, 16 }
  0x5e   : > { %3454 = vmatprep.mubr.msk.bf16.mxu1 %vm719_vm5, %v3146_v55  ;;  %3459 = vmatpush3.bf16.msra.mxu1 %v819_v14  ;;  %v1487_v7 = vrot.slane %v1486_v3, 4  ;;  %v1846_v22 = vshll.u32 %v3265_v16, 16  ;;  %v1857_v29 = vshrl.u32 %v3267_v23, 16  ;;  %v1860_v34 = vshll.u32 %v3267_v23, 16  ;;  %v3174_v14 = vld [vmem:[%s4104_s19 + $0xc] sm:$0x1] }
  0x5f   : > { %1601 = vrot.lane.b32.xlu0 %v4315_v12, %s3932_s24  ;;  %3704 = vmatprep.subr.msk.bf16.mxu1 %vm937_vm6, %v4313_v15  ;;  %v1831_v49 = vrot.slane %v1829_v17, 4  ;;  %v1834_v24 = vrot.slane %v1832_v18, 5  ;;  %v1845_v28 = vrot.slane %v1843_v20, 4  ;;  %v1871_v35 = vshrl.u32 %v3269_v43, 16  ;;  %v3271_v17 = vld [vmem:[%s4099_s12 + $0x70] sm:$0xf] }
  0x60   : > { %v1492_v8 = vsel %vm4125_vm4, %v1487_v7, %v1491_v19  ;;  %v1848_v32 = vrot.slane %v1846_v22, 5  ;;  %v1874_v36 = vshll.u32 %v3269_v43, 16  ;;  %v1838_v38 = vshll.u32 %v3264_v26, 16  ;;  %v1142_v19 = vld [vmem:[%s4733_s7] sm:$0x3] }
  0x61   : > { %v4330_v10 = vcombine.low %v1478_v13, %v1492_v8  ;;  %v1835_v37 = vor.u32 %v1834_v24, %v1831_v49  ;;  %v1852_v41 = vshll.u32 %v3266_v30, 16  ;;  %v1859_v2 = vrot.slane %v1857_v29, 4  ;;  %v3176_v7 = vld [vmem:[%s4104_s19 + $0x14] sm:$0x1]  ;;  %v3273_v18 = vld [vmem:[%s4099_s12 + $0x78] sm:$0xf] }
  0x62   : > { %v1849_v44 = vor.u32 %v1848_v32, %v1845_v28  ;;  %v1862_v46 = vrot.slane %v1860_v34, 5  ;;  %v1873_v47 = vrot.slane %v1871_v35, 4  ;;  %v1876_v48 = vrot.slane %v1874_v36, 5  ;;  %v3798_v26 = vld [vmem:[%s4099_s12 + $0x60] ss:$8 sps:$4 sm:$0xff]  }
  0x63   : > { %1603 = vrot.lane.b32.xlu1 %v4330_v10, %s3932_s24  ;;  %v1737_v52 = vsel %vm937_vm6, %v3254_v1, 0  ;;  %v1866_v53 = vshll.u32 %v3268_v39, 16  ;;  %v1836_v59 = vrot.slane %v1835_v37, 4  ;;  %v1840_v60 = vrot.slane %v1838_v38, 5  ;;  %v3801_v36 = vld [vmem:[%s4099_s12 + $0x70] ss:$8 sps:$4 sm:$0xff]   ;;  %s4667_s24 = scalar_lea.hbm %s4736_s10, %s3360_s16 }
  0x64   : > { %v1880_v61 = vshll.u32 %v3270_v42, 16  ;;  %v1031_v55 = vshrl.u32 %v3173_v51, 16  ;;  %v1034_v63 = vshll.u32 %v3173_v51, 16  ;;  %v1850_v1 = vrot.slane %v1849_v44, 4  ;;  %v3179_v44 = vld [vmem:[%s4104_s19 + $0x20] sm:$0xf] }
  0x65   : > { %3455 = vmatmul.mubr.msk.bf16.gmra.mrb[4].mxu1 %vm719_vm5, %v3147_v9  ;;  %v1854_v0 = vrot.slane %v1852_v41, 5  ;;  %v1863_v4 = vor.u32 %v1862_v46, %v1859_v2  ;;  %v1877_v6 = vor.u32 %v1876_v48, %v1873_v47  ;;  %v939_v3 = vsel %vm937_vm6, %v4313_v15, 0  ;;  %v4383_v41 = vld [vmem:[%s4729_s3 + $0x10] sm:$0xff]  }
  0x66   : > { %v1868_v13 = vrot.slane %v1866_v53, 5  ;;  %v1841_v9 = vsel %vm4125_vm4, %v1836_v59, %v1840_v60  ;;  %v1045_v11 = vshrl.u32 %v3175_v62, 16  ;;  %v1048_v16 = vshll.u32 %v3175_v62, 16  ;;  %v3272_v47 = vld [vmem:[%s4099_s12 + $0x74] sm:$0x1] }
  0x67   : > { %v1882_v20 = vrot.slane %v1880_v61, 5  ;;  %v1033_v15 = vrot.slane %v1031_v55, 4  ;;  %v1040_v22 = vshll.u32 %v3174_v14, 16  ;;  %v1855_v23 = vsel %vm4125_vm4, %v1850_v1, %v1854_v0  ;;  %v3799_v48 = vld [vmem:[%s4104_s19 + $0x8] ss:$8 sps:$4 sm:$0xff]  }
  0x68   : > { %v1864_v43 = vrot.slane %v1863_v4, 4  ;;  %v1878_v49 = vrot.slane %v1877_v6, 4  ;;  %v1054_v24 = vshll.u32 %v3176_v7, 16  ;;  %v1885_v28 = vshrl.u32 %v3271_v17, 16  ;;  %v3275_v59 = vld [vmem:[%s4099_s12 + $0x80] sm:$0xf] }
  0x69   : > { %v1888_v29 = vshll.u32 %v3271_v17, 16  ;;  %v1899_v30 = vshrl.u32 %v3273_v18, 16  ;;  %v1902_v32 = vshll.u32 %v3273_v18, 16  ;;  %v1967_v35 = vsel %vm624_vm0, %v3279_v58, 0  ;;  %v3274_v6 = vld [vmem:[%s4099_s12 + $0x7c] sm:$0x1] }
  0x6a   : > { %v4375_v37 = vsel %vm624_vm0, %v1142_v19, 0  ;;  %v1047_v38 = vrot.slane %v1045_v11, 4  ;;  %v1050_v39 = vrot.slane %v1048_v16, 5  ;;  %v4385_v2 = vrot.slane %v1040_v22, 5 }
  0x6b   : > { %v1869_v51 = vsel %vm4125_vm4, %v1864_v43, %v1868_v13  ;;  %v4394_v53 = vrot.slane %v1054_v24, 5  ;;  %v1887_v60 = vrot.slane %v1885_v28, 4  ;;  %v1890_v61 = vrot.slane %v1888_v29, 5  ;;  %v3276_v28 = vld [vmem:[%s4099_s12 + $0x84] sm:$0x1] }
  0x6c   : > { %v1901_v62 = vrot.slane %v1899_v30, 4  ;;  %v1904_v55 = vrot.slane %v1902_v32, 5  ;;  %v1051_v1 = vor.u32 %v1050_v39, %v1047_v38  ;;  %v1073_v0 = vshrl.u32 %v3179_v44, 16  ;;  %v3800_v29 = vld [vmem:[%s4104_s19 + $0x18] ss:$8 sps:$4 sm:$0xff]  }
  0x6d   : > { %v1076_v4 = vshll.u32 %v3179_v44, 16  ;;  %v1894_v14 = vshll.u32 %v3272_v47, 16  ;;  %v1913_v11 = vshrl.u32 %v3275_v59, 16  ;;  %v1916_v16 = vshll.u32 %v3275_v59, 16  ;;  %v3180_v30 = vld [vmem:[%s4104_s19 + $0x24] sm:$0x1] }
  0x6e   : > { %v1891_v22 = vor.u32 %v1890_v61, %v1887_v60  ;;  %v1908_v43 = vshll.u32 %v3274_v6, 16  ;;  %v1075_v24 = vrot.slane %v1073_v0, 4  ;;  %v3803_v38 = vld [vmem:[%s4104_s19 + $0x28] ss:$8 sps:$4 sm:$0xff]   ;;  %v1082_v61 = vshll.u32 %v3180_v30, 16 }
  0x6f   : > { %v1915_v39 = vrot.slane %v1913_v11, 4 }
  0x70   : > { %v1892_v47 = vrot.slane %v1891_v22, 4  ;;  %v1084_v30 = vrot.slane %v1082_v61, 5 }
  0xa1   : > { %v1598_v21 = vpop.permute.xlu0 %1597 }
  0xa2   : > { %3510 = vmatprep.mubr.msk.bf16.mxu0 %vm611_vm3, %v1598_v21  ;;  %v1036_v21 = vrot.slane %v1034_v63, 5  ;;  %v3277_v63 = vld [vmem:[%s4099_s12 + $0x88] sm:$0xf] }
  0xa3   : > { %v1927_v17 = vshrl.u32 %v3277_v63, 16  ;;  %v1930_v18 = vshll.u32 %v3277_v63, 16 }
  0xa4   : > { %v799_v25 = vpop.permute.xlu1 %798  ;;  %v1037_v42 = vor.u32 %v1036_v21, %v1033_v15  ;;  %v3802_v15 = vld [vmem:[%s4099_s12 + $0x80] ss:$8 sps:$4 sm:$0xff]  }
  0xa5   : > { %3460 = vmatprep.mubr.msk.bf16.mxu1 %vm611_vm3, %v799_v25  ;;  %v3177_v25 = vld [vmem:[%s4104_s19 + $0x18] sm:$0xf]  ;;  %v1929_v44 = vrot.slane %v1927_v17, 4 }
  0xa6   : > { %v1059_v46 = vshrl.u32 %v3177_v25, 16 }
  0xa8   : > { %v4405_v13 = vrot.slane %v1059_v46, 4  ;;  %v1932_v46 = vrot.slane %v1930_v18, 5 }
  0xab   : > { %v1600_v57 = vpop.permute.xlu0 %1599 }
  0xac   : > { %3511 = vmatmul.mubr.msk.bf16.vlgmr.msra.gmra.mrb[0].mxu0 %vm611_vm3, %v1600_v57  ;;  %v3178_v57 = vld [vmem:[%s4104_s19 + $0x1c] sm:$0x1] }
  0xad   : > { %3519 = vmatpush3.bf16.msra.mxu0 %v1737_v52  ;;  %3520 = vmatprep.mubr.msk.bf16.mxu0 %vm924_vm7, %v3797_v40  ;;  %v4378_v40 = vcombine.low %v1841_v9, %v1855_v23  ;;  %v1883_v52 = vsel %vm4125_vm4, %v1878_v49, %v1882_v20  ;;  %v1068_v7 = vshll.u32 %v3178_v57, 16  ;;  %v3183_v20 = vld [vmem:[%s4104_s19 + $0x30] sm:$0xf]  ;;  %v1905_v23 = vor.u32 %v1904_v55, %v1901_v62  ;;  %v3185_v62 = vld [vmem:[%s4104_s19 + $0x38] sm:$0xf]  ;;  %v4433_v55 = vld [vmem:[%s4729_s3 + $0x8] sm:$0xff]  }
  0xae   : > { %3710 = vmatprep.subr.msk.bf16.mxu0 %vm624_vm0, %v3279_v58  ;;  %v1062_v58 = vshll.u32 %v3177_v25, 16  ;;  %v1052_v49 = vrot.slane %v1051_v1, 4  ;;  %v1078_v25 = vrot.slane %v1076_v4, 5  ;;  %v1922_v57 = vshll.u32 %v3276_v28, 16  ;;  %v3187_v4 = vld [vmem:[%s4104_s19 + $0x40] sm:$0xf] }
  0xaf   : > { %v801_v8 = vpop.permute.xlu1 %800  ;;  %v4427_v60 = vrot.slane %v1068_v7, 5  ;;  %v3182_v7 = vld [vmem:[%s4104_s19 + $0x2c] sm:$0x1]  ;;  %v1118_v17 = vshll.u32 %v3185_v62, 16  ;;  %v1129_v18 = vshrl.u32 %v3187_v4, 16 }
  0xb0   : > { %3461 = vmatmul.mubr.msk.bf16.vlgmr.msra.gmra.mrb[0].mxu1 %vm611_vm3, %v801_v8  ;;  %v3181_v8 = vld [vmem:[%s4104_s19 + $0x28] sm:$0xf]  ;;  %v4413_v21 = vrot.slane %v1062_v58, 5  ;;  %v1057_v6 = vsel %vm4125_vm4, %v1052_v49, %v4394_v53  ;;  %v1115_v53 = vshrl.u32 %v3185_v62, 16 }
  0xb1   : > { %3469 = vmatpush3.bf16.msra.mxu1 %v939_v3  ;;  %v4401_v3 = vcombine.low %v1869_v51, %v1883_v52  ;;  %v1087_v32 = vshrl.u32 %v3181_v8, 16  ;;  %v1910_v51 = vrot.slane %v1908_v43, 5  ;;  %v3278_v52 = vld [vmem:[%s4099_s12 + $0x8c] sm:$0x1]  ;;  %v3804_v43 = vld [vmem:[%s4104_s19 + $0x38] ss:$8 sps:$4 sm:$0xff]  }
  0xb2   : > { %3705 = vmatprep.subr.msk.bf16.mxu1 %vm624_vm0, %v1142_v19  ;;  %v4403_v19 = vrot.slane %v1037_v42, 4  ;;  %v1918_v42 = vrot.slane %v1916_v16, 5  ;;  %v1065_v59 = vor.u32 %v4413_v21, %v4405_v13  ;;  %v1936_v13 = vshll.u32 %v3278_v52, 16 }
  0xb3   : > { %v803_v34 = vpop.permute.xlu0 %802  ;;  %v1089_v63 = vrot.slane %v1087_v32, 4  ;;  %v1096_v21 = vshll.u32 %v3182_v7, 16  ;;  %v3186_v32 = vld [vmem:[%s4104_s19 + $0x3c] sm:$0x1] }
  0xb4   : > { %3464 = vmatprep.mubr.msk.bf16.mxu1 %vm611_vm3, %v803_v34  ;;  %v1090_v34 = vshll.u32 %v3181_v8, 16  ;;  %v1043_v58 = vsel %vm4125_vm4, %v4403_v19, %v4385_v2  ;;  %v1933_v19 = vor.u32 %v1932_v46, %v1929_v44  ;;  %v3184_v8 = vld [vmem:[%s4104_s19 + $0x34] sm:$0x1] }
  0xb5   : > { %v3189_v28 = vcombine.low %v1043_v58, %v1057_v6  ;;  %v1098_v44 = vrot.slane %v1096_v21, 5  ;;  %v3835_v21 = vld [vmem:[%s4731_s5 + $0x2] sm:$0x3] }
  0xb6   : > { %v1092_v1 = vrot.slane %v1090_v34, 5  ;;  %v1117_v34 = vrot.slane %v1115_v53, 4  ;;  %v3809_v53 = vld [vmem:[%s4099_s12 + $0x48] ss:$8 sps:$4 sm:$0xff]  }
  0xb8   : > { %3521 = vmatmul.mubr.msk.bf16.vlgmr.msra.gmra.mrb[0].mxu0 %vm924_vm7, %v3798_v26  ;;  %v1896_v26 = vrot.slane %v1894_v14, 5  ;;  %v1919_v14 = vor.u32 %v1918_v42, %v1915_v39  ;;  %v3299_v39 = vld [vmem:[%s4730_s4 + $0x4] sm:$0x3] }
  0xb9   : > { %v805_v9 = vpop.permute.xlu1 %804  ;;  %3529 = vmatpush3.bf16.msra.mxu0 %v1967_v35  ;;  %3524 = vmatprep.mubr.msk.bf16.mxu0 %vm924_vm7, %v3801_v36  ;;  %v1101_v35 = vshrl.u32 %v3183_v20, 16  ;;  %v1104_v36 = vshll.u32 %v3183_v20, 16  ;;  %v1132_v20 = vshll.u32 %v3187_v4, 16 }
  0xba   : > { %3465 = vmatmul.mubr.msk.bf16.gmra.mrb[4].mxu1 %vm611_vm3, %v805_v9  ;;  %3538 = vmatprep.subr.bf16.mxu0 %v4383_v41  ;;  %v1079_v9 = vor.u32 %v1078_v25, %v1075_v24  ;;  %v1897_v11 = vsel %vm4125_vm4, %v1892_v47, %v1896_v26  ;;  %v1920_v24 = vrot.slane %v1919_v14, 4  ;;  %v1934_v25 = vrot.slane %v1933_v19, 4 }
  0xbb   : > { %3470 = vmatprep.mubr.msk.bf16.mxu1 %vm924_vm7, %v3799_v48  ;;  %v1906_v48 = vrot.slane %v1905_v23, 4  ;;  %v1103_v0 = vrot.slane %v1101_v35, 4  ;;  %v1106_v2 = vrot.slane %v1104_v36, 5  ;;  %v1110_v23 = vshll.u32 %v3184_v8, 16 }
  0xbc   : > { %v1938_v26 = vrot.slane %v1936_v13, 5  ;;  %v1120_v35 = vrot.slane %v1118_v17, 5  ;;  %v1131_v36 = vrot.slane %v1129_v18, 4  ;;  %v3232_v13 = vld [vmem:[%s4730_s4 + $0x2] sm:$0x3] }
  0xbd   : > { %v1911_v16 = vsel %vm4125_vm4, %v1906_v48, %v1910_v51  ;;  %v1107_v22 = vor.u32 %v1106_v2, %v1103_v0  ;;  %v1112_v47 = vrot.slane %v1110_v23, 5  ;;  %v3188_v48 = vld [vmem:[%s4104_s19 + $0x44] sm:$0x1]  ;;  %v3810_v18 = vld [vmem:[%s4099_s12 + $0x58] ss:$8 sps:$4 sm:$0xff]  }
  0xbe   : > { %v3282_v49 = vcombine.low %v1897_v11, %v1911_v16  ;;  %v1939_v52 = vsel %vm4125_vm4, %v1934_v25, %v1938_v26  ;;  %v1121_v58 = vor.u32 %v1120_v35, %v1117_v34  ;;  %v1138_v61 = vshll.u32 %v3188_v48, 16  ;;  %v3811_v11 = vld [vmem:[%s4200_s28 + $0x20] ss:$8 sps:$4 sm:$0xff]   ;;  %v3308_v17 = vld [vmem:[%s4731_s5 + $0x4] sm:$0x3] }
  0xbf   : > { %v1108_v46 = vrot.slane %v1107_v22, 4  ;;  %v3814_v22 = vld [vmem:[%s4099_s12 + $0x78] ss:$8 sps:$4 sm:$0xff]   ;;  %v2417_v23 = vsel %vm624_vm0, %v3308_v17, 0  ;;  %v3340_v48 = vld [vmem:[%s4200_s28 + $0x30] sm:$0xf] }
  0xc0   : > { %3525 = vmatmul.mubr.msk.bf16.gmra.mrb[4].mxu0 %vm924_vm7, %v3802_v15  ;;  %v1093_v15 = vor.u32 %v1092_v1, %v1089_v63  ;;  %v1122_v6 = vrot.slane %v1121_v58, 4  ;;  %v1140_v19 = vrot.slane %v1138_v61, 5  ;;  %v3334_v35 = vld [vmem:[%s4200_s28 + $0x18] sm:$0xf]  ;;  %v2698_v61 = vshrl.u32 %v3340_v48, 16 }
  0xc1   : > { %3530 = vmatprep.mubr.msk.bf16.mxu0 %vm611_vm3, %v4378_v40  ;;  %v1924_v40 = vrot.slane %v1922_v57, 5  ;;  %v1124_v57 = vshll.u32 %v3186_v32, 16  ;;  %v1113_v1 = vsel %vm4125_vm4, %v1108_v46, %v1112_v47  ;;  %v2659_v46 = vshll.u32 %v3334_v35, 16  ;;  %v3338_v47 = vld [vmem:[%s4200_s28 + $0x28] sm:$0xf] }
  0xc2   : > { %3471 = vmatmul.mubr.msk.bf16.vlgmr.msra.gmra.mrb[0].mxu1 %vm924_vm7, %v3800_v29  ;;  %v1066_v29 = vrot.slane %v1065_v59, 4  ;;  %v1094_v42 = vrot.slane %v1093_v15, 4  ;;  %v1520_v15 = vsel %vm624_vm0, %v3232_v13, 0  ;;  %v2684_v58 = vshrl.u32 %v3338_v47, 16 }
  0xc3   : > { %3474 = vmatprep.mubr.msk.bf16.mxu1 %vm924_vm7, %v3803_v38  ;;  %3479 = vmatpush3.bf16.msra.mxu1 %v4375_v37  ;;  %v1080_v37 = vrot.slane %v1079_v9, 4  ;;  %v1134_v38 = vrot.slane %v1132_v20, 5  ;;  %v1925_v51 = vsel %vm4125_vm4, %v1920_v24, %v1924_v40  ;;  %v1126_v2 = vrot.slane %v1124_v57, 5  ;;  %v3808_v9 = vld [vmem:[%s4200_s28 + $0x10] ss:$8 sps:$4 sm:$0xff]  }
  0xc4   : > { %3488 = vmatprep.subr.bf16.mxu1 %v4433_v55  ;;  %v3283_v62 = vcombine.low %v1925_v51, %v1939_v52  ;;  %v1099_v63 = vsel %vm4125_vm4, %v1094_v42, %v1098_v44  ;;  %v2319_v40 = vsel %vm624_vm0, %v3299_v39, 0  ;;  %v3813_v20 = vld [vmem:[%s4099_s12 + $0x68] ss:$8 sps:$4 sm:$0xff]  }
  0xc5   : > { %v1135_v59 = vor.u32 %v1134_v38, %v1131_v36  ;;  %v3191_v4 = vcombine.low %v1099_v63, %v1113_v1  ;;  %v1127_v7 = vsel %vm4125_vm4, %v1122_v6, %v1126_v2  ;;  %v3815_v38 = vld [vmem:[%s4200_s28 + $0x8] ss:$8 sps:$4 sm:$0xff]  }
  0xc7   : > { %v1136_v14 = vrot.slane %v1135_v59, 4  ;;  %v2687_v59 = vshll.u32 %v3338_v47, 16 }
  0xc8   : > { %3531 = vmatmul.mubr.msk.bf16.vlgmr.msra.gmra.mrb[0].mxu0 %vm611_vm3, %v4401_v3  ;;  %v1071_v3 = vsel %vm4125_vm4, %v1066_v29, %v4427_v60  ;;  %v3806_v60 = vld [vmem:[%s4200_s28] ss:$8 sps:$4 sm:$0xff]   ;;  %v3333_v29 = vld [vmem:[%s4200_s28 + $0x14] sm:$0x1] }
  0xc9   : > { %3539 = vmatpush3.bf16.msra.mxu0 %v4383_v41  ;;  %3534 = vmatprep.mubr.msk.bf16.mxu0 %vm611_vm3, %v3282_v49  ;;  %v1085_v41 = vsel %vm4125_vm4, %v1080_v37, %v1084_v30  ;;  %v1141_v8 = vsel %vm4125_vm4, %v1136_v14, %v1140_v19  ;;  %v3330_v49 = vld [vmem:[%s4200_s28 + $0x8] sm:$0xf]  ;;  %v2651_v44 = vshll.u32 %v3333_v29, 16  ;;  %v3337_v19 = vld [vmem:[%s4200_s28 + $0x24] sm:$0x1] }
  0xca   : > { %3475 = vmatmul.mubr.msk.bf16.gmra.mrb[4].mxu1 %vm924_vm7, %v3804_v43  ;;  %3711 = vmatprep.subr.msk.bf16.mxu0 %vm624_vm0, %v3299_v39  ;;  %v3190_v0 = vcombine.low %v1071_v3, %v1085_v41  ;;  %v3192_v16 = vcombine.low %v1127_v7, %v1141_v8  ;;  %v3321_v43 = vld [vmem:[%s4732_s6 + $0x8] sm:$0xf]  ;;  %v2628_v25 = vshrl.u32 %v3330_v49, 16  ;;  %v2631_v26 = vshll.u32 %v3330_v49, 16  ;;  %v3336_v39 = vld [vmem:[%s4200_s28 + $0x20] sm:$0xf] }
  0xcb   : > { %3480 = vmatprep.mubr.msk.bf16.mxu1 %vm611_vm3, %v3189_v28  ;;  %v2536_v24 = vsel %vm937_vm6, %v3321_v43, 0  ;;  %v3331_v28 = vld [vmem:[%s4200_s28 + $0xc] sm:$0x1]  ;;  %v2670_v3 = vshrl.u32 %v3336_v39, 16  ;;  %v2673_v57 = vshll.u32 %v3336_v39, 16 }
  0xcc   : > { %v2630_v37 = vrot.slane %v2628_v25, 4  ;;  %v2633_v30 = vrot.slane %v2631_v26, 5  ;;  %v2637_v42 = vshll.u32 %v3331_v28, 16  ;;  %v3816_v41 = vld [vmem:[%s4200_s28 + $0x18] ss:$8 sps:$4 sm:$0xff]  }
  0xcd   : > { %v2675_v7 = vrot.slane %v2673_v57, 5 }
  0xce   : > { %v2634_v51 = vor.u32 %v2633_v30, %v2630_v37  ;;  %v2639_v1 = vrot.slane %v2637_v42, 5  ;;  %v3343_v30 = vld [vmem:[%s4200_s28 + $0x3c] sm:$0x1] }
  0xcf   : > { %v2721_v47 = vshll.u32 %v3343_v30, 16 }
  0xd0   : > { %3535 = vmatmul.mubr.msk.bf16.gmra.mrb[4].mxu0 %vm611_vm3, %v3283_v62  ;;  %v2701_v62 = vshll.u32 %v3340_v48, 16  ;;  %v2635_v6 = vrot.slane %v2634_v51, 4 }
  0xd1   : > { %3540 = vmatprep.mubr.msk.bf16.mxu0 %vm719_vm5, %v3806_v60  ;;  %v2653_v60 = vrot.slane %v2651_v44, 5 }
  0xd2   : > { %3481 = vmatmul.mubr.msk.bf16.vlgmr.msra.gmra.mrb[0].mxu1 %vm611_vm3, %v3190_v0  ;;  %v3335_v0 = vld [vmem:[%s4200_s28 + $0x1c] sm:$0x1] }
  0xd3   : > { %3484 = vmatprep.mubr.msk.bf16.mxu1 %vm611_vm3, %v3191_v4  ;;  %3489 = vmatpush3.bf16.msra.mxu1 %v4433_v55  ;;  %v3812_v55 = vld [vmem:[%s4200_s28 + $0x30] ss:$8 sps:$4 sm:$0xff]   ;;  %v2661_v4 = vrot.slane %v2659_v46, 5 }
  0xd4   : > { %3706 = vmatprep.subr.msk.bf16.mxu1 %vm624_vm0, %v3232_v13  ;;  %v2672_v13 = vrot.slane %v2670_v3, 4 }
  0xd8   : > { %3541 = vmatmul.mubr.msk.bf16.vlgmr.msra.gmra.mrb[0].mxu0 %vm719_vm5, %v3808_v9  ;;  %v3817_v9 = vld [vmem:[%s4200_s28 + $0x28] ss:$8 sps:$4 sm:$0xff]  }
  0xd9   : > { %3549 = vmatpush3.bf16.msra.mxu0 %v2319_v40  ;;  %3544 = vmatprep.mubr.msk.bf16.mxu0 %vm719_vm5, %v3811_v11  ;;  %v3342_v11 = vld [vmem:[%s4200_s28 + $0x38] sm:$0xf]  ;;  %v2689_v40 = vrot.slane %v2687_v59, 5  ;;  %v2723_v59 = vrot.slane %v2721_v47, 5 }
  0xda   : > { %3485 = vmatmul.mubr.msk.bf16.gmra.mrb[4].mxu1 %vm611_vm3, %v3192_v16  ;;  %3712 = vmatprep.subr.msk.bf16.mxu0 %vm624_vm0, %v3308_v17  ;;  %v2686_v16 = vrot.slane %v2684_v58, 4  ;;  %v2703_v17 = vrot.slane %v2701_v62, 5 }
  0xdb   : > { %3490 = vmatprep.mubr.msk.bf16.mxu1 %vm719_vm5, %v3809_v53  ;;  %v2700_v53 = vrot.slane %v2698_v61, 4 }
  0xe0   : > { %3545 = vmatmul.mubr.msk.bf16.gmra.mrb[4].mxu0 %vm719_vm5, %v3812_v55  ;;  %v3344_v55 = vld [vmem:[%s4200_s28 + $0x40] sm:$0xf] }
  0xe1   : > { %3550 = vmatprep.mubr.msk.bf16.mxu0 %vm611_vm3, %v4252_v33  ;;  %v2397_v33 = vpop.permute.xlu0 %2396  ;;  %v2726_v49 = vshrl.u32 %v3344_v55, 16 }
  0xe2   : > { %3491 = vmatmul.mubr.msk.bf16.vlgmr.msra.gmra.mrb[0].mxu1 %vm719_vm5, %v3810_v18  ;;  %v2665_v18 = vshll.u32 %v3335_v0, 16 }
  0xe3   : > { %3494 = vmatprep.mubr.msk.bf16.mxu1 %vm719_vm5, %v3813_v20  ;;  %3499 = vmatpush3.bf16.msra.mxu1 %v1520_v15  ;;  %v2679_v20 = vshll.u32 %v3337_v19, 16  ;;  %v3339_v15 = vld [vmem:[%s4200_s28 + $0x2c] sm:$0x1] }
  0xe4   : > { %3708 = vmatprep.subr.msk.bf16.mxu1 %vm624_vm0, %v3835_v21  ;;  %v3341_v21 = vld [vmem:[%s4200_s28 + $0x34] sm:$0x1]  ;;  %v2667_v26 = vrot.slane %v2665_v18, 5 }
  0xe5   : > { %v2707_v25 = vshll.u32 %v3341_v21, 16  ;;  %v2681_v37 = vrot.slane %v2679_v20, 5 }
  0xe7   : > { %v2709_v44 = vrot.slane %v2707_v25, 5 }
  0xe8   : > { %3551 = vmatmul.mubr.msk.bf16.vlgmr.msra.gmra.mrb[0].mxu0 %vm611_vm3, %v4264_v54  ;;  %v2401_v54 = vpop.permute.xlu0 %2400 }
  0xe9   : > { %3559 = vmatpush3.bf16.msra.mxu0 %v2417_v23  ;;  %3554 = vmatprep.mubr.msk.bf16.mxu0 %vm611_vm3, %v4275_v27  ;;  %v2399_v27 = vpop.permute.xlu1 %2398 }
  0xea   : > { %3495 = vmatmul.mubr.msk.bf16.gmra.mrb[4].mxu1 %vm719_vm5, %v3814_v22  ;;  %3713 = vmatprep.subr.msk.bf16.mxu0 %vm937_vm6, %v3321_v43  ;;  %v2640_v22 = vsel %vm4125_vm4, %v2635_v6, %v2639_v1 }
  0xeb   : > { %3500 = vmatprep.mubr.msk.bf16.mxu1 %vm611_vm3, %v4145_v56  ;;  %v3332_v56 = vld [vmem:[%s4200_s28 + $0x10] sm:$0xf] }
  0xed   : > { %v2403_v36 = vpop.permute.xlu1 %2402 }
  0xf0   : > { %3555 = vmatmul.mubr.msk.bf16.gmra.mrb[4].mxu0 %vm611_vm3, %v4287_v50  ;;  %v3346_v50 = vld [vmem:[%s4733_s7 + $0x4] sm:$0x3] }
  0xf1   : > { %3560 = vmatprep.mubr.msk.bf16.mxu0 %vm611_vm3, %v2397_v33  ;;  %v1604_v63 = vpop.permute.xlu1 %1603  ;;  %v2766_v8 = vsel %vm624_vm0, %v3346_v50, 0  ;;  %v2676_v33 = vor.u32 %v2675_v7, %v2672_v13 }
  0xf2   : > { %3501 = vmatmul.mubr.msk.bf16.vlgmr.msra.gmra.mrb[0].mxu1 %vm611_vm3, %v4190_v45  ;;  %v1602_v45 = vpop.permute.xlu0 %1601 }
  0xf3   : > { %3504 = vmatprep.mubr.msk.bf16.mxu1 %vm611_vm3, %v4315_v12  ;;  %3589 = vmatpush3.bf16.msra.mxu1 %v4302_v5  ;;  %v2642_v12 = vshrl.u32 %v3332_v56, 16  ;;  %v2645_v5 = vshll.u32 %v3332_v56, 16  ;;  %v2729_v56 = vshll.u32 %v3344_v55, 16  ;;  %v2677_v29 = vrot.slane %v2676_v33, 4 }
  0xf5   : > { %v2644_v32 = vrot.slane %v2642_v12, 4  ;;  %v2647_v34 = vrot.slane %v2645_v5, 5  ;;  %v3818_v12 = vld [vmem:[%s4200_s28 + $0x38] ss:$8 sps:$4 sm:$0xff]   ;;  %v2682_v48 = vsel %vm4125_vm4, %v2677_v29, %v2681_v37 }
  0xf7   : > { %v2648_v52 = vor.u32 %v2647_v34, %v2644_v32 }
  0xf8   : > { %3561 = vmatmul.mubr.msk.bf16.vlgmr.msra.gmra.mrb[0].mxu0 %vm611_vm3, %v2399_v27  ;;  %v2715_v27 = vshll.u32 %v3342_v11, 16 }
  0xf9   : > { %3569 = vmatpush3.bf16.msra.mxu0 %v2536_v24  ;;  %3564 = vmatprep.mubr.msk.bf16.mxu0 %vm611_vm3, %v2401_v54  ;;  %v2649_v14 = vrot.slane %v2648_v52, 4  ;;  %v2712_v54 = vshrl.u32 %v3342_v11, 16  ;;  %v2690_v24 = vor.u32 %v2689_v40, %v2686_v16 }
  0xfa   : > { %3505 = vmatmul.mubr.msk.bf16.gmra.mrb[4].mxu1 %vm611_vm3, %v4330_v10  ;;  %3714 = vmatprep.subr.msk.bf16.mxu0 %vm624_vm0, %v3346_v50  ;;  %v2656_v10 = vshrl.u32 %v3334_v35, 16  ;;  %v2693_v50 = vshll.u32 %v3339_v15, 16  ;;  %v2717_v34 = vrot.slane %v2715_v27, 5  ;;  %v2728_v35 = vrot.slane %v2726_v49, 4 }
  0xfb   : > { %3514 = vmatprep.mubr.msk.bf16.mxu1 %vm611_vm3, %v1602_v45  ;;  %v2654_v23 = vsel %vm4125_vm4, %v2649_v14, %v2653_v60  ;;  %v2704_v45 = vor.u32 %v2703_v17, %v2700_v53  ;;  %v2714_v32 = vrot.slane %v2712_v54, 4  ;;  %v2873_v27 = vlaneseq }
  0xfc   : > { %v2658_v2 = vrot.slane %v2656_v10, 4  ;;  %v3347_v5 = vcombine.low %v2640_v22, %v2654_v23  ;;  %v2695_v39 = vrot.slane %v2693_v50, 5  ;;  %v3345_v10 = vld [vmem:[%s4200_s28 + $0x44] sm:$0x1]  ;;  %s431_s28 = sand.u32 1, %s3906_s14  }
  0xfd   : > { %v2705_v42 = vrot.slane %v2704_v45, 4  ;;  %v2718_v51 = vor.u32 %v2717_v34, %v2714_v32  ;;  %v2735_v3 = vshll.u32 %v3345_v10, 16  ;;  %v2874_v49 = vand.u32 127, %v2873_v27  ;;  %s3132_s22 = sshll.u32 %s431_s28, 6  ;;  %v3356_v27 = vld [vmem:[%s4735_s9] ss:$0 sm:$0xff] }
  0xfe   : > { %v2662_v43 = vor.u32 %v2661_v4, %v2658_v2  ;;  %s4646_s30 = scalar_lea.vmem [#allocation2], %s3132_s22  ;;  %s4674_s19 = scalar_lea.sflag [#allocation3], %s431_s28 }
  0xff   : > { %v2719_v62 = vrot.slane %v2718_v51, 4  ;;  %v2737_v1 = vrot.slane %v2735_v3, 5  ;;  %vm2875_vm8 = vcmp.lt.s32.totalorder %v2874_v49, 8  ;;  %s2996_s17 = sshll.u32 %s4646_s30, 4  ;;  %s4669_s17 = int_to_ptr.vmem [resolvable:$true] %s2996_s17 }
 0x100   : > { %3565 = vmatmul.mubr.msk.bf16.gmra.mrb[4].mxu0 %vm611_vm3, %v2403_v36  ;;  %v2663_v28 = vrot.slane %v2662_v43, 4  ;;  %v2731_v36 = vrot.slane %v2729_v56, 5  ;;  %s3836_s22 = scalar_lea.vmem %s4669_s17, 1024  ;;  %p3843_p5 = scmp.lt.s32.totalorder %s4669_s17, %s3841_s29 }
 0x101   : > { %3570 = vmatprep.mubr.msk.bf16.mxu0 %vm924_vm7, %v3815_v38  ;;  %v2691_v38 = vrot.slane %v2690_v24, 4  ;;  %v2724_v60 = vsel %vm4125_vm4, %v2719_v62, %v2723_v59  ;;  %p3837_p1 = scmp.ne.s32.totalorder %s4669_s17, %s3836_s22  ;;  %p3844_p6 = scmp.lt.s32.totalorder %s3842_s25, %s3836_s22 }
 0x102   : > { %v2668_v46 = vsel %vm4125_vm4, %v2663_v28, %v2667_v26  ;;  %v2732_v52 = vor.u32 %v2731_v36, %v2728_v35 }
 0x103   : > { %v2696_v57 = vsel %vm4125_vm4, %v2691_v38, %v2695_v39  ;;  %v3348_v58 = vcombine.low %v2668_v46, %v2682_v48  ;;  %p3838_p2 = pnand %p3837_p1, %p4042_p3  ;;  %p3845_p7 = por %p3844_p6, %p3843_p5 }
 0x105   : > { %p3839_p4 = pneg %p3838_p2 }
 0x106   : > { %3515 = vmatmul.mubr.msk.bf16.vlgmr.msra.gmra.mrb[4].mxu1 %vm611_vm3, %v1604_v63  ;;  %v2733_v63 = vrot.slane %v2732_v52, 4 }
 0x107   : > { %p3846_p9 = pnand %p3845_p7, %p3839_p4 }
 0x108   : > { %3571 = vmatmul.mubr.msk.bf16.vlgmr.msra.gmra.mrb[0].mxu0 %vm924_vm7, %v3816_v41  ;;  %v2710_v41 = vsel %vm4125_vm4, %v2705_v42, %v2709_v44  ;;  %v2738_v0 = vsel %vm4125_vm4, %v2733_v63, %v2737_v1 }
 0x109   : > { %3579 = vmatpush3.bf16.msra.mxu0 %v2766_v8  ;;  %3574 = vmatprep.mubr.msk.bf16.mxu0 %vm924_vm7, %v3817_v9  ;;  %v3349_v61 = vcombine.low %v2696_v57, %v2710_v41  ;;  %v3350_v2 = vcombine.low %v2724_v60, %v2738_v0 }
 0x110   : > { %3575 = vmatmul.mubr.msk.bf16.gmra.mrb[4].mxu0 %vm924_vm7, %v3818_v12 }
 0x111   : > { %3580 = vmatprep.mubr.msk.bf16.mxu0 %vm611_vm3, %v3347_v5 }
 0x118   : > { %3581 = vmatmul.mubr.msk.bf16.vlgmr.msra.gmra.mrb[0].mxu0 %vm611_vm3, %v3348_v58 }
 0x119   : > { %3584 = vmatprep.mubr.msk.bf16.mxu0 %vm611_vm3, %v3349_v61 }
 0x120   : > { %3585 = vmatmul.mubr.msk.bf16.gmra.mrb[4].mxu0 %vm611_vm3, %v3350_v2 }
 0x1c5   : > { %v3502_v4 = vpop.f32.mrb[0].mxu1 }
 0x1c6   : > { %v1556_v6 = vpop.f32.mrb[1].mxu1 }
 0x1c7   : > { %v3503_v14 = vpop.f32.mrb[2].mxu1 }
 0x1c8   : > { %v1559_v19 = vpop.f32.mrb[3].mxu1 }
 0x1d9   : > { %v3516_v13 = vpop.f32.mrb[4].mxu1 }
 0x1da   : > { %v1670_v7 = vpop.f32.mrb[5].mxu1 }
 0x1db   : > { %v3517_v8 = vpop.f32.mrb[6].mxu1 }
 0x1dc   : > { %v1673_v9 = vpop.f32.mrb[7].mxu1 }
 0x1eb   : > { %v3582_v11 = vpop.f32.mrb[0].mxu0 }
 0x1ec   : > { %v3590_v16 = vadd.f32 %v3582_v11, %v3502_v4  ;;  %v2802_v40 = vpop.f32.mrb[1].mxu0 }
 0x1ed   : > { %v3591_v53 = vadd.f32 %v2802_v40, %v1556_v6  ;;  %v3583_v17 = vpop.f32.mrb[2].mxu0 }
 0x1ee   : > { %v3592_v55 = vadd.f32 %v3583_v17, %v3503_v14  ;;  %v2805_v18 = vpop.f32.mrb[3].mxu0  ;;  %2845 = vadd.xlane.f32.xlu0 %v3590_v16 }
 0x1ef   : > { %v3593_v31 = vadd.f32 %v2805_v18, %v1559_v19 }
 0x1f1   : > { %2843 = vadd.xlane.f32.xlu1 %v3593_v31 }
 0x1f2   : > { %2841 = vadd.xlane.f32.xlu0 %v3591_v53 }
 0x1f3   : > { %v3586_v20 = vpop.f32.mrb[4].mxu0 }
 0x1f4   : > { %v3594_v15 = vadd.f32 %v3586_v20, %v3516_v13  ;;  %v2818_v21 = vpop.f32.mrb[5].mxu0 }
 0x1f5   : > { %v3595_v22 = vadd.f32 %v2818_v21, %v1670_v7  ;;  %v3587_v23 = vpop.f32.mrb[6].mxu0 }
 0x1f6   : > { %v3596_v43 = vadd.f32 %v3587_v23, %v3517_v8  ;;  %v2821_v33 = vpop.f32.mrb[7].mxu0  ;;  %2847 = vadd.xlane.f32.xlu0 %v3592_v55 }
 0x1f7   : > { %v3597_v54 = vadd.f32 %v2821_v33, %v1673_v9  ;;  %2849 = vadd.xlane.f32.xlu1 %v3595_v22 }
 0x1fa   : > { %2851 = vadd.xlane.f32.xlu0 %v3597_v54 }
 0x1fb   : > { %2853 = vadd.xlane.f32.xlu1 %v3594_v15 }
 0x1fe   : > { %2855 = vadd.xlane.f32.xlu0 %v3596_v43 }
 0x27b   : > { %v2846_v56 = vpop.xlane.xlu0 %2845 }
 0x27c   : > { %v2859_v24 = vmul.f32 0.125, %v2846_v56 }
 0x27e   : > { %v2867_v50 = vsub.f32 %v3590_v16, %v2859_v24  ;;  %v2844_v45 = vpop.xlane.xlu1 %2843 }
 0x27f   : > { %v2842_v25 = vpop.xlane.xlu0 %2841  ;;  %v2858_v28 = vmul.f32 0.125, %v2844_v45 }
 0x280   : > { %v2857_v26 = vmul.f32 0.125, %v2842_v25  ;;  %v4596_v12 = vsel %vm2875_vm8, %v2867_v50, 0.0 }
 0x281   : > { %v2888_v5 = vmul.f32 %v4596_v12, %v4596_v12  ;;  %v2866_v38 = vsub.f32 %v3593_v31, %v2858_v28 }
 0x282   : > { %v2865_v29 = vsub.f32 %v3591_v53, %v2857_v26 }
 0x283   : > { %v2848_v37 = vpop.xlane.xlu0 %2847  ;;  %2898 = vadd.xlane.f32.xlu1 %v2888_v5  ;;  %v4616_v41 = vsel %vm2875_vm8, %v2866_v38, 0.0 }
 0x284   : > { %v2860_v30 = vmul.f32 0.125, %v2848_v37  ;;  %v2850_v32 = vpop.xlane.xlu1 %2849  ;;  %v4601_v34 = vsel %vm2875_vm8, %v2865_v29, 0.0  ;;  %v2887_v62 = vmul.f32 %v4616_v41, %v4616_v41 }
 0x285   : > { %v2861_v35 = vmul.f32 0.125, %v2850_v32  ;;  %v2886_v36 = vmul.f32 %v4601_v34, %v4601_v34 }
 0x286   : > { %v2868_v39 = vsub.f32 %v3592_v55, %v2860_v30 }
 0x287   : > { %v2869_v42 = vsub.f32 %v3595_v22, %v2861_v35  ;;  %2894 = vadd.xlane.f32.xlu1 %v2886_v36  ;;  %v2852_v44 = vpop.xlane.xlu0 %2851  ;;  %v3355_v22 = vld [vmem:[%s4734_s8] ss:$0 sm:$0xff] }
 0x288   : > { %v2862_v10 = vmul.f32 0.125, %v2852_v44  ;;  %v2854_v46 = vpop.xlane.xlu1 %2853  ;;  %v4606_v47 = vsel %vm2875_vm8, %v2868_v39, 0.0 }
 0x289   : > { %v2863_v48 = vmul.f32 0.125, %v2854_v46  ;;  %v2889_v51 = vmul.f32 %v4606_v47, %v4606_v47  ;;  %v4611_v52 = vsel %vm2875_vm8, %v2869_v42, 0.0 }
 0x28a   : > { %v2870_v3 = vsub.f32 %v3597_v54, %v2862_v10  ;;  %v2890_v57 = vmul.f32 %v4611_v52, %v4611_v52 }
 0x28b   : > { %v2871_v58 = vsub.f32 %v3594_v15, %v2863_v48  ;;  %2900 = vadd.xlane.f32.xlu0 %v2889_v51  ;;  %v2856_v59 = vpop.xlane.xlu0 %2855 }
 0x28c   : > { %v2864_v61 = vmul.f32 0.125, %v2856_v59  ;;  %2902 = vadd.xlane.f32.xlu1 %v2890_v57  ;;  %v4626_v0 = vsel %vm2875_vm8, %v2870_v3, 0.0 }
 0x28d   : > { %v4621_v63 = vsel %vm2875_vm8, %v2871_v58, 0.0  ;;  %v2891_v2 = vmul.f32 %v4626_v0, %v4626_v0 }
 0x28e   : > { %v2872_v1 = vsub.f32 %v3596_v43, %v2864_v61  ;;  %v2892_v60 = vmul.f32 %v4621_v63, %v4621_v63 }
 0x28f   : > { %2896 = vadd.xlane.f32.xlu0 %v2887_v62 }
 0x290   : > { %2906 = vadd.xlane.f32.xlu1 %v2892_v60  ;;  %v4631_v4 = vsel %vm2875_vm8, %v2872_v1, 0.0 }
 0x291   : > { %v2893_v6 = vmul.f32 %v4631_v4, %v4631_v4 }
 0x293   : > { %2904 = vadd.xlane.f32.xlu0 %v2891_v2 }
 0x297   : > { %2908 = vadd.xlane.f32.xlu0 %v2893_v6 }
 0x310   : > { %v2899_v14 = vpop.xlane.xlu1 %2898 }
 0x311   : > { %v2912_v19 = vmul.f32 0.125, %v2899_v14 }
 0x313   : > { %v2920_v13 = vadd.f32 1e-05, %v2912_v19 }
 0x314   : > { %v2895_v7 = vpop.xlane.xlu1 %2894 }
 0x315   : > { %3819 = vrsqrt.f32 %v2920_v13  ;;  %v2910_v8 = vmul.f32 0.125, %v2895_v7 }
 0x317   : > { %v2918_v9 = vadd.f32 1e-05, %v2910_v8 }
 0x318   : > { %v2901_v11 = vpop.xlane.xlu0 %2900 }
 0x319   : > { %3821 = vrsqrt.f32 %v2918_v9  ;;  %v2913_v16 = vmul.f32 0.125, %v2901_v11  ;;  %v2903_v40 = vpop.xlane.xlu1 %2902 }
 0x31a   : > { %v2914_v53 = vmul.f32 0.125, %v2903_v40 }
 0x31b   : > { %v2921_v17 = vadd.f32 1e-05, %v2913_v16 }
 0x31c   : > { %v2922_v55 = vadd.f32 1e-05, %v2914_v53  ;;  %v2897_v18 = vpop.xlane.xlu0 %2896 }
 0x31d   : > { %3823 = vrsqrt.f32 %v2921_v17  ;;  %v2911_v31 = vmul.f32 0.125, %v2897_v18  ;;  %v2907_v20 = vpop.xlane.xlu1 %2906 }
 0x31e   : > { %3825 = vrsqrt.f32 %v2922_v55  ;;  %v2916_v15 = vmul.f32 0.125, %v2907_v20 }
 0x31f   : > { %v3820_v21 = vpop.eup %3819  ;;  %v2919_v23 = vadd.f32 1e-05, %v2911_v31 }
 0x320   : > { %v2936_v43 = vmul.f32 %v3820_v21, %v4596_v12  ;;  %v2924_v33 = vadd.f32 1e-05, %v2916_v15  ;;  %v2905_v54 = vpop.xlane.xlu0 %2904 }
 0x321   : > { %3827 = vrsqrt.f32 %v2919_v23  ;;  %v2915_v49 = vmul.f32 0.125, %v2905_v54 }
 0x322   : > { %v2951_v56 = vmul.f32 %v3355_v22, %v2936_v43  ;;  %3829 = vrsqrt.f32 %v2924_v33 }
 0x323   : > { %v3822_v24 = vpop.eup %3821  ;;  %v2923_v50 = vadd.f32 1e-05, %v2915_v49 }
 0x324   : > { %v2966_v45 = vadd.f32 %v3356_v27, %v2951_v56  ;;  %v2934_v25 = vmul.f32 %v3822_v24, %v4601_v34  ;;  %v2909_v26 = vpop.xlane.xlu0 %2908 }
 0x325   : > { %3831 = vrsqrt.f32 %v2923_v50  ;;  %v2917_v5 = vmul.f32 0.125, %v2909_v26 }
 0x326   : > { %2974 = vst [vmem:[%s4646_s30 + $0x10] sm:$0xff] %v2966_v45  ;;  %v2949_v12 = vmul.f32 %v3355_v22, %v2934_v25 }
 0x327   : > { %v3824_v28 = vpop.eup %3823  ;;  %v2925_v29 = vadd.f32 1e-05, %v2917_v5 }
 0x328   : > { %v3826_v37 = vpop.eup %3825  ;;  %v2964_v30 = vadd.f32 %v3356_v27, %v2949_v12  ;;  %v2937_v32 = vmul.f32 %v3824_v28, %v4606_v47 }
 0x329   : > { %v2938_v34 = vmul.f32 %v3826_v37, %v4611_v52  ;;  %3833 = vrsqrt.f32 %v2925_v29 }
 0x32a   : > { %2972 = vst [vmem:[%s4646_s30] sm:$0xff] %v2964_v30  ;;  %v2952_v35 = vmul.f32 %v3355_v22, %v2937_v32 }
 0x32b   : > { %v3828_v36 = vpop.eup %3827  ;;  %v2953_v38 = vmul.f32 %v3355_v22, %v2938_v34 }
 0x32c   : > { %v3830_v39 = vpop.eup %3829  ;;  %v2967_v42 = vadd.f32 %v3356_v27, %v2952_v35  ;;  %v2935_v44 = vmul.f32 %v3828_v36, %v4616_v41 }
 0x32d   : > { %v2968_v10 = vadd.f32 %v3356_v27, %v2953_v38  ;;  %v2940_v46 = vmul.f32 %v3830_v39, %v4621_v63 }
 0x32e   : > { %2975 = vst [vmem:[%s4646_s30 + $0x18] sm:$0xff] %v2967_v42  ;;  %v2950_v48 = vmul.f32 %v3355_v22, %v2935_v44 }
 0x32f   : > { %v3832_v47 = vpop.eup %3831  ;;  %2976 = vst [vmem:[%s4646_s30 + $0x20] sm:$0xff] %v2968_v10  ;;  %v2955_v51 = vmul.f32 %v3355_v22, %v2940_v46 }
 0x330   : > { %v2965_v52 = vadd.f32 %v3356_v27, %v2950_v48  ;;  %v2939_v3 = vmul.f32 %v3832_v47, %v4626_v0 }
 0x331   : > { %v2970_v57 = vadd.f32 %v3356_v27, %v2955_v51 }
 0x332   : > { %2973 = vst [vmem:[%s4646_s30 + $0x8] sm:$0xff] %v2965_v52  ;;  %v2954_v41 = vmul.f32 %v3355_v22, %v2939_v3 }
 0x333   : > { %v3834_v58 = vpop.eup %3833  ;;  %2978 = vst [vmem:[%s4646_s30 + $0x30] sm:$0xff] %v2970_v57 }
 0x334   : > { %v2969_v59 = vadd.f32 %v3356_v27, %v2954_v41  ;;  %v2941_v61 = vmul.f32 %v3834_v58, %v4631_v4 }
 0x336   : > { %2977 = vst [vmem:[%s4646_s30 + $0x28] sm:$0xff] %v2969_v59  ;;  %v2956_v62 = vmul.f32 %v3355_v22, %v2941_v61 }
 0x338   : > { %v2971_v63 = vadd.f32 %v3356_v27, %v2956_v62 }
 0x33a   : > { %2979 = vst [vmem:[%s4646_s30 + $0x38] sm:$0xff] %v2971_v63 }
 0x33b   : > { %3849 = shalt.err (!%p3846_p9)
}
 0x33c   : > { %s3850_s28 = scalar_lea.hbm %s4667_s24, 1024  ;;  %s3854_s23 = scalar_lea.hbm %s4736_s10, 8192 }
 0x33d   : > { %p3851_p10 = scmp.ne.s32.totalorder %s4667_s24, %s3850_s28  ;;  %p3855_p13 = scmp.lt.u32.totalorder %s4667_s24, %s4736_s10 }
 0x33e   : > { %p3856_p0 = scmp.lt.u32.totalorder %s3854_s23, %s3850_s28  ;;  %p3858_p2 = scmp.lt.u32.totalorder %s3850_s28, %s4667_s24 }
 0x33f   : > { %p3852_p11 = pnand %p3851_p10, %p4042_p3 }
 0x340   : > { %p3857_p1 = por %p3856_p0, %p3855_p13 }
 0x341   : > { %p3853_p12 = pneg %p3852_p11 }
 0x342   : > { %p3859_p4 = por %p3858_p2, %p3857_p1 }
 0x344   : > { %p3860_p5 = pnand %p3859_p4, %p3853_p12 }
 0x346   : > { %3863 = shalt.err (!%p3860_p5)
}
 0x347   : > { %s3934_s11 = smov 128   ;;  %s3935_s22 = smov 8  }
 0x348   : > { %3718 = dma.vmem_to_hbm [thread:$0]  (%p4042_p3), %s4669_s17, 1024, %s4667_s24, %s4674_s19, %s3934_s11, %s3934_s11, %s3935_s22  }
 0x349 PF: > { %p3724_p6 = scmp.ge.s32.totalorder %s3930_s20, 2  ;;  %s3011_s21 = sand.u32 1, %s3902_s13  }
 0x34a   : > { %s3012_s29 = scalar_lea.sflag [#allocation3], %s3011_s21 }
 0x34b   : > { %p3721_p7 = pnand %p3724_p6, %p4051_p8 }
 0x34d   : > { %3897 = dma.done.wait (!%p3721_p7), %s3012_s29, 1024  }
 0x34e   : > { %3899 = vsyncadd (!%p3721_p7), %s3012_s29, 4294966272  ;;  %s23_s20 = sadd.s32 1, %s3930_s20   ;;  %s4751_s25 = sld [smem:[#allocation9_spill]] }
 0x34f   : > { %p20_p9 = scmp.ge.s32.totalorder %s23_s20, 10   ;;  %s4752_s16 = sld [smem:[#allocation5_spill]] }
 0x350   : > { %s4753_s17 = sld [smem:[#allocation6_spill]]  ;;  %s4754_s18 = sld [smem:[#allocation7_spill]] }
 0x351   : > { %s4755_s19 = sld [smem:[#allocation8_spill]]  ;;  %s4756_s13 = smov %s3906_s14 }
 0x352   : > { %s4757_s14 = smov %s3910_s15  ;;  %22 = sbr.rel (!%p20_p9) target bundleno = 5 (0x5), region = 114 }
 0x354   : > { %s4758_s15 = smov %s4751_s25 }
 0x359   :  { %3017 = vsyncpa [#allocation3], 1 }
 0x35a   :  { %3019 = vsyncpa [#allocation3 + $0x1], 1 }

</bundles_post_ra>
